<compile_context>
chip_gen: v7x
topology: tpu7x:2x2x1
jax: 0.10.0
libtpu: 0.0.40
codegen_flags: <defaults>
</compile_context>

<pallas_src>
import jax
import jax.numpy as jnp
from jax.experimental import pallas as pl
from jax.experimental.pallas import tpu as pltpu

EPS = 1e-5
LANES = 128


def _round_up(x, m):
    return (x + m - 1) // m * m


def _make_conv_stats_kernel(H, W, C, Cp, mxu_dtype, pre_affine_relu):
    """conv3x3 (padding=1) + per-sample BN partial stats for one (H, W, C) sample.

    If `pre_affine_relu`, the input is first mapped through relu(x*s + b) (the folded
    BatchNorm of the previous conv) before the convolution.
    """

    def kernel(*refs):
        if pre_affine_relu:
            x_ref, s_ref, b_ref, w_ref, y_ref, st_ref, xp_ref, acc_ref = refs
        else:
            x_ref, w_ref, y_ref, st_ref, xp_ref, acc_ref = refs

        # Halo-only zeroing of the spatially padded scratch: the interior is fully
        # overwritten right below, so no full-buffer memset (corner overlap is fine).
        zrow = jnp.zeros((1, W + 2, C), jnp.float32)
        xp_ref[0:1, :, :] = zrow
        xp_ref[H + 1:H + 2, :, :] = zrow
        zcol = jnp.zeros((H + 2, 1, C), jnp.float32)
        xp_ref[:, 0:1, :] = zcol
        xp_ref[:, W + 1:W + 2, :] = zcol

        # Interior: (optionally) folded-BN + ReLU in f32, written straight into the
        # padded scratch (no separate `h` round trip / extra activation copy).
        xin = x_ref[0]                                        # (H, W, C) f32
        if pre_affine_relu:
            s = s_ref[...].reshape(1, 1, C)
            b = b_ref[...].reshape(1, 1, C)
            xin = jnp.maximum(xin * s + b, 0.0)
        xp_ref[1:H + 1, 1:W + 1, :] = xin

        # conv3x3 as 9 per-tap matmuls accumulated into an explicit f32 VMEM scratch
        # (no im2col concat slab).  Weights are tap-major (9*C, Cp), Cp lane-dense.
        for t in range(9):
            dy, dx = t // 3, t % 3
            tap = xp_ref[dy:dy + H, dx:dx + W, :].reshape(H * W, C)
            contrib = jnp.dot(tap.astype(mxu_dtype), w_ref[t * C:(t + 1) * C, :],
                              preferred_element_type=jnp.float32)
            if t == 0:
                acc_ref[...] = contrib                         # no zero-init memset
            else:
                acc_ref[...] += contrib
        acc = acc_ref[...]                                     # (H*W, Cp) f32

        # Per-sample partial BN statistics in ONE pass (sum and sum-of-squares);
        # the cross-sample reduction happens in the tiny JAX epilogue.
        ssum = jnp.sum(acc, axis=0, keepdims=True)             # (1, Cp)
        ssq = jnp.sum(acc * acc, axis=0, keepdims=True)        # (1, Cp)
        st_ref[0] = jnp.concatenate([ssum, ssq], axis=0)       # (2, Cp)

        # Raw conv output stored at the real channel width (no Cp-inflated HBM traffic).
        y_ref[0] = acc[:, :C].reshape(H, W, C)

    return kernel


def _make_bn_residual_relu_kernel(H, W, C):
    """out = relu(y*s + b + identity) for one (H, W, C) sample (pure elementwise)."""

    def kernel(y_ref, x_ref, s_ref, b_ref, out_ref):
        s = s_ref[...].reshape(1, 1, C)
        b = b_ref[...].reshape(1, 1, C)
        out_ref[0] = jnp.maximum(y_ref[0] * s + b + x_ref[0], 0.0)

    return kernel


def _fold_bn(stats, gamma, beta, count):
    """Fold training-mode BatchNorm (biased variance) into y = x*s + b'.

    stats: (N, 2, Cp) per-sample partial [sum, sumsq]; reduction + folding is tiny
    and done in f32 JAX.  (E[x^2]-E[x]^2 in f32 is fine at these magnitudes; clamp
    guards against tiny negative round-off.)
    """
    C = gamma.shape[0]
    ssum = jnp.sum(stats[:, 0, :C], axis=0)
    ssq = jnp.sum(stats[:, 1, :C], axis=0)
    mean = ssum / count
    var = jnp.maximum(ssq / count - mean * mean, 0.0)
    s = gamma * jax.lax.rsqrt(var + EPS)
    b = beta - mean * s
    return s.reshape(1, C), b.reshape(1, C)


def res_block_pallas(x_nhwc, w1, g1, b1, w2, g2, b2, *, mxu_dtype=jnp.float32):
    """ResBlock forward (training-mode BN, Identity shortcut).

    x_nhwc: (N, H, W, C) f32;  w1/w2: (3, 3, C, C) HWIO;  g*/b*: (C,) BN gamma/beta.
    mxu_dtype=jnp.float32 for bit-tight parity, jnp.bfloat16 for native MXU rate.
    """
    N, H, W, Cin = x_nhwc.shape
    Cout = w1.shape[-1]
    assert Cin == Cout, "Identity shortcut requires in_channel == out_channel"
    C = Cout
    Cp = _round_up(C, LANES)            # lane-dense MXU output / accumulator width
    count = N * H * W

    # Weights: HWIO -> tap-major (9*C, Cp); only the OUT-channel dim is zero-padded so
    # the MXU output dim and accumulator stores are 128-lane dense.  Activations stay
    # at the real channel count in HBM.
    def prep_w(w):
        wp = jnp.pad(w, ((0, 0), (0, 0), (0, 0), (0, Cp - C)))
        return wp.reshape(9 * C, Cp).astype(mxu_dtype)

    w1f, w2f = prep_w(w1), prep_w(w2)
    x = x_nhwc.astype(jnp.float32)

    sample_spec = pl.BlockSpec((1, H, W, C), lambda n: (n, 0, 0, 0))
    weight_spec = pl.BlockSpec((9 * C, Cp), lambda n: (0, 0))     # resident across grid
    vec_spec = pl.BlockSpec((1, C), lambda n: (0, 0))
    stats_spec = pl.BlockSpec((1, 2, Cp), lambda n: (n, 0, 0))
    scratch = [pltpu.VMEM((H + 2, W + 2, C), jnp.float32),        # padded activation
               pltpu.VMEM((H * W, Cp), jnp.float32)]              # f32 conv accumulator
    cparams = pltpu.CompilerParams(dimension_semantics=("parallel",))
    out_conv = (jax.ShapeDtypeStruct((N, H, W, C), jnp.float32),
                jax.ShapeDtypeStruct((N, 2, Cp), jnp.float32))

    # Pass 1: y1 = conv1(x) + partial BN1 stats.
    y1, st1 = pl.pallas_call(
        _make_conv_stats_kernel(H, W, C, Cp, mxu_dtype, pre_affine_relu=False),
        out_shape=out_conv,
        grid_spec=pltpu.PrefetchScalarGridSpec(
            num_scalar_prefetch=0, grid=(N,),
            in_specs=[sample_spec, weight_spec],
            out_specs=[sample_spec, stats_spec],
            scratch_shapes=scratch),
        compiler_params=cparams,
    )(x, w1f)

    s1, b1f = _fold_bn(st1, g1, b1, count)

    # Pass 2: y2 = conv2(relu(bn1_folded(y1))) + partial BN2 stats.
    y2, st2 = pl.pallas_call(
        _make_conv_stats_kernel(H, W, C, Cp, mxu_dtype, pre_affine_relu=True),
        out_shape=out_conv,
        grid_spec=pltpu.PrefetchScalarGridSpec(
            num_scalar_prefetch=0, grid=(N,),
            in_specs=[sample_spec, vec_spec, vec_spec, weight_spec],
            out_specs=[sample_spec, stats_spec],
            scratch_shapes=scratch),
        compiler_params=cparams,
    )(y1, s1, b1f, w2f)

    s2, b2f = _fold_bn(st2, g2, b2, count)

    # Pass 3: out = relu(bn2_folded(y2) + identity).
    out = pl.pallas_call(
        _make_bn_residual_relu_kernel(H, W, C),
        out_shape=jax.ShapeDtypeStruct((N, H, W, C), jnp.float32),
        grid_spec=pltpu.PrefetchScalarGridSpec(
            num_scalar_prefetch=0, grid=(N,),
            in_specs=[sample_spec, sample_spec, vec_spec, vec_spec],
            out_specs=sample_spec),
        compiler_params=cparams,
    )(y2, x, s2, b2f)

    return out


def res_block_reference(x, w1, g1, b1, w2, g2, b2):
    """Pure-JAX reference (NHWC) matching PyTorch ResBlock.forward in training mode."""
    def conv(v, w):
        return jax.lax.conv_general_dilated(
            v, w, window_strides=(1, 1), padding="SAME",
            dimension_numbers=("NHWC", "HWIO", "NHWC"),
            precision=jax.lax.Precision.HIGHEST)

    def bn(v, g, b):
        m = jnp.mean(v, axis=(0, 1, 2), keepdims=True)
        va = jnp.mean((v - m) ** 2, axis=(0, 1, 2), keepdims=True)
        return (v - m) * jax.lax.rsqrt(va + EPS) * g + b

    h = jax.nn.relu(bn(conv(x, w1), g1, b1))
    return jax.nn.relu(x + bn(conv(h, w2), g2, b2))


if __name__ == "__main__":
    # Small shapes: batch=2, in_channel=out_channel=8, spatial=16x16
    # (downsample=None -> Identity, so in_channel must equal out_channel).
    N, C, H, W = 2, 8, 16, 16
    key = jax.random.PRNGKey(0)
    k_x, k_w1, k_w2, k_g1, k_b1, k_g2, k_b2 = jax.random.split(key, 7)

    x_nchw = jax.random.normal(k_x, (N, C, H, W), jnp.float32)   # PyTorch-style input
    x_nhwc = jnp.transpose(x_nchw, (0, 2, 3, 1))                 # kernel layout

    w1 = 0.1 * jax.random.normal(k_w1, (3, 3, C, C), jnp.float32)  # HWIO
    w2 = 0.1 * jax.random.normal(k_w2, (3, 3, C, C), jnp.float32)
    g1 = 1.0 + 0.1 * jax.random.normal(k_g1, (C,), jnp.float32)
    b1 = 0.1 * jax.random.normal(k_b1, (C,), jnp.float32)
    g2 = 1.0 + 0.1 * jax.random.normal(k_g2, (C,), jnp.float32)
    b2 = 0.1 * jax.random.normal(k_b2, (C,), jnp.float32)

    ref = jax.block_until_ready(res_block_reference(x_nhwc, w1, g1, b1, w2, g2, b2))

    # f32 MXU operands: tight parity with the f32 reference.
    out = jax.block_until_ready(
        res_block_pallas(x_nhwc, w1, g1, b1, w2, g2, b2, mxu_dtype=jnp.float32))
    assert out.shape == (N, H, W, C)
    err = float(jnp.max(jnp.abs(out - ref)))
    assert jnp.allclose(out, ref, atol=2e-3, rtol=2e-3), err

    # bf16 MXU operands (native MXU rate, f32 accumulation): looser tolerance.
    out_bf16 = jax.block_until_ready(
        res_block_pallas(x_nhwc, w1, g1, b1, w2, g2, b2, mxu_dtype=jnp.bfloat16))
    err_bf16 = float(jnp.max(jnp.abs(out_bf16 - ref)))
    assert jnp.allclose(out_bf16, ref, atol=6e-2, rtol=6e-2), err_bf16

    print("KERNEL_OK")
</pallas_src>

<mosaic_0001>
module attributes {stable_mosaic.version = 11 : i64} {
  func.func @kernel(%arg0: i32, %arg1: memref<1x16x16x8xf32, #tpu.memory_space<vmem>>, %arg2: memref<72x128xf32, #tpu.memory_space<vmem>>, %arg3: memref<1x16x16x8xf32, #tpu.memory_space<vmem>>, %arg4: memref<1x2x128xf32, #tpu.memory_space<vmem>>, %arg5: memref<18x18x8xf32, #tpu.memory_space<vmem>>, %arg6: memref<256x128xf32, #tpu.memory_space<vmem>>) attributes {dimension_semantics = [#tpu.dimension_semantics<parallel>], iteration_bounds = array<i64: 2>, scalar_prefetch = 0 : i64, scratch_operands = 2 : i64, tpu.core_type = #tpu.core_type<tc>, window_params = [{transform_indices = @transform_0, window_bounds = array<i64: 1, 16, 16, 8>}, {pipeline_mode = #tpu.pipeline_mode<synchronous>, transform_indices = @transform_1, window_bounds = array<i64: 72, 128>}, {transform_indices = @transform_2, window_bounds = array<i64: 1, 16, 16, 8>}, {transform_indices = @transform_3, window_bounds = array<i64: 1, 2, 128>}]} {
    %cst = arith.constant 0.000000e+00 : f32
    %0 = vector.broadcast %cst : f32 to vector<1x18x8xf32>
    %c0 = arith.constant 0 : index
    %c0_0 = arith.constant 0 : index
    %c0_1 = arith.constant 0 : index
    %1 = vector.load %arg5[%c0, %c0_0, %c0_1] : memref<18x18x8xf32, #tpu.memory_space<vmem>>, vector<1x18x8xf32>
    tpu.vector_store %arg5[%c0, %c0_0, %c0_1], %0 {strides = array<i32>} : memref<18x18x8xf32, #tpu.memory_space<vmem>>, vector<1x18x8xf32>,
    %c17 = arith.constant 17 : index
    %c0_2 = arith.constant 0 : index
    %c0_3 = arith.constant 0 : index
    %2 = vector.load %arg5[%c17, %c0_2, %c0_3] : memref<18x18x8xf32, #tpu.memory_space<vmem>>, vector<1x18x8xf32>
    tpu.vector_store %arg5[%c17, %c0_2, %c0_3], %0 {strides = array<i32>} : memref<18x18x8xf32, #tpu.memory_space<vmem>>, vector<1x18x8xf32>,
    %cst_4 = arith.constant 0.000000e+00 : f32
    %3 = vector.broadcast %cst_4 : f32 to vector<18x1x8xf32>
    %c0_5 = arith.constant 0 : index
    %c0_6 = arith.constant 0 : index
    %c0_7 = arith.constant 0 : index
    %4 = vector.load %arg5[%c0_5, %c0_6, %c0_7] : memref<18x18x8xf32, #tpu.memory_space<vmem>>, vector<18x1x8xf32>
    tpu.vector_store %arg5[%c0_5, %c0_6, %c0_7], %3 {strides = array<i32>} : memref<18x18x8xf32, #tpu.memory_space<vmem>>, vector<18x1x8xf32>,
    %c0_8 = arith.constant 0 : index
    %c17_9 = arith.constant 17 : index
    %c0_10 = arith.constant 0 : index
    %5 = vector.load %arg5[%c0_8, %c17_9, %c0_10] : memref<18x18x8xf32, #tpu.memory_space<vmem>>, vector<18x1x8xf32>
    tpu.vector_store %arg5[%c0_8, %c17_9, %c0_10], %3 {strides = array<i32>} : memref<18x18x8xf32, #tpu.memory_space<vmem>>, vector<18x1x8xf32>,
    %c0_11 = arith.constant 0 : index
    %c0_12 = arith.constant 0 : index
    %c0_13 = arith.constant 0 : index
    %c0_14 = arith.constant 0 : index
    %6 = vector.load %arg1[%c0_11, %c0_12, %c0_13, %c0_14] : memref<1x16x16x8xf32, #tpu.memory_space<vmem>>, vector<1x16x16x8xf32>
    %7 = vector.shape_cast %6 : vector<1x16x16x8xf32> to vector<16x16x8xf32>
    %c1 = arith.constant 1 : index
    %c1_15 = arith.constant 1 : index
    %c0_16 = arith.constant 0 : index
    %8 = vector.load %arg5[%c1, %c1_15, %c0_16] : memref<18x18x8xf32, #tpu.memory_space<vmem>>, vector<16x16x8xf32>
    tpu.vector_store %arg5[%c1, %c1_15, %c0_16], %7 {strides = array<i32>} : memref<18x18x8xf32, #tpu.memory_space<vmem>>, vector<16x16x8xf32>,
    %c0_17 = arith.constant 0 : index
    %c0_18 = arith.constant 0 : index
    %c0_19 = arith.constant 0 : index
    %9 = vector.load %arg5[%c0_17, %c0_18, %c0_19] : memref<18x18x8xf32, #tpu.memory_space<vmem>>, vector<16x16x8xf32>
    %10 = vector.shape_cast %9 : vector<16x16x8xf32> to vector<256x8xf32>
    %c0_20 = arith.constant 0 : index
    %c0_21 = arith.constant 0 : index
    %11 = vector.load %arg2[%c0_20, %c0_21] : memref<72x128xf32, #tpu.memory_space<vmem>>, vector<8x128xf32>
    %cst_22 = arith.constant dense<0.000000e+00> : vector<256x128xf32>
    %12 = tpu.matmul %10, %11, %cst_22 {dimension_numbers = #tpu.dot_dimension_numbers<[1], [0], [0], [1], [0, 0, 1, 1], [], []>} : vector<256x8xf32>, vector<8x128xf32>, vector<256x128xf32> -> vector<256x128xf32>
    %c0_23 = arith.constant 0 : index
    %c0_24 = arith.constant 0 : index
    %13 = vector.load %arg6[%c0_23, %c0_24] : memref<256x128xf32, #tpu.memory_space<vmem>>, vector<256x128xf32>
    tpu.vector_store %arg6[%c0_23, %c0_24], %12 {strides = array<i32>} : memref<256x128xf32, #tpu.memory_space<vmem>>, vector<256x128xf32>,
    %c0_25 = arith.constant 0 : index
    %c1_26 = arith.constant 1 : index
    %c0_27 = arith.constant 0 : index
    %14 = vector.load %arg5[%c0_25, %c1_26, %c0_27] : memref<18x18x8xf32, #tpu.memory_space<vmem>>, vector<16x16x8xf32>
    %15 = vector.shape_cast %14 : vector<16x16x8xf32> to vector<256x8xf32>
    %c8 = arith.constant 8 : index
    %c0_28 = arith.constant 0 : index
    %16 = vector.load %arg2[%c8, %c0_28] : memref<72x128xf32, #tpu.memory_space<vmem>>, vector<8x128xf32>
    %cst_29 = arith.constant dense<0.000000e+00> : vector<256x128xf32>
    %17 = tpu.matmul %15, %16, %cst_29 {dimension_numbers = #tpu.dot_dimension_numbers<[1], [0], [0], [1], [0, 0, 1, 1], [], []>} : vector<256x8xf32>, vector<8x128xf32>, vector<256x128xf32> -> vector<256x128xf32>
    %c0_30 = arith.constant 0 : index
    %c0_31 = arith.constant 0 : index
    %18 = vector.load %arg6[%c0_30, %c0_31] : memref<256x128xf32, #tpu.memory_space<vmem>>, vector<256x128xf32>
    %19 = arith.addf %18, %17 : vector<256x128xf32>
    %c0_32 = arith.constant 0 : index
    %c0_33 = arith.constant 0 : index
    %20 = vector.load %arg6[%c0_32, %c0_33] : memref<256x128xf32, #tpu.memory_space<vmem>>, vector<256x128xf32>
    tpu.vector_store %arg6[%c0_32, %c0_33], %19 {strides = array<i32>} : memref<256x128xf32, #tpu.memory_space<vmem>>, vector<256x128xf32>,
    %c0_34 = arith.constant 0 : index
    %c2 = arith.constant 2 : index
    %c0_35 = arith.constant 0 : index
    %21 = vector.load %arg5[%c0_34, %c2, %c0_35] : memref<18x18x8xf32, #tpu.memory_space<vmem>>, vector<16x16x8xf32>
    %22 = vector.shape_cast %21 : vector<16x16x8xf32> to vector<256x8xf32>
    %c16 = arith.constant 16 : index
    %c0_36 = arith.constant 0 : index
    %23 = vector.load %arg2[%c16, %c0_36] : memref<72x128xf32, #tpu.memory_space<vmem>>, vector<8x128xf32>
    %cst_37 = arith.constant dense<0.000000e+00> : vector<256x128xf32>
    %24 = tpu.matmul %22, %23, %cst_37 {dimension_numbers = #tpu.dot_dimension_numbers<[1], [0], [0], [1], [0, 0, 1, 1], [], []>} : vector<256x8xf32>, vector<8x128xf32>, vector<256x128xf32> -> vector<256x128xf32>
    %c0_38 = arith.constant 0 : index
    %c0_39 = arith.constant 0 : index
    %25 = vector.load %arg6[%c0_38, %c0_39] : memref<256x128xf32, #tpu.memory_space<vmem>>, vector<256x128xf32>
    %26 = arith.addf %25, %24 : vector<256x128xf32>
    %c0_40 = arith.constant 0 : index
    %c0_41 = arith.constant 0 : index
    %27 = vector.load %arg6[%c0_40, %c0_41] : memref<256x128xf32, #tpu.memory_space<vmem>>, vector<256x128xf32>
    tpu.vector_store %arg6[%c0_40, %c0_41], %26 {strides = array<i32>} : memref<256x128xf32, #tpu.memory_space<vmem>>, vector<256x128xf32>,
    %c1_42 = arith.constant 1 : index
    %c0_43 = arith.constant 0 : index
    %c0_44 = arith.constant 0 : index
    %28 = vector.load %arg5[%c1_42, %c0_43, %c0_44] : memref<18x18x8xf32, #tpu.memory_space<vmem>>, vector<16x16x8xf32>
    %29 = vector.shape_cast %28 : vector<16x16x8xf32> to vector<256x8xf32>
    %c24 = arith.constant 24 : index
    %c0_45 = arith.constant 0 : index
    %30 = vector.load %arg2[%c24, %c0_45] : memref<72x128xf32, #tpu.memory_space<vmem>>, vector<8x128xf32>
    %cst_46 = arith.constant dense<0.000000e+00> : vector<256x128xf32>
    %31 = tpu.matmul %29, %30, %cst_46 {dimension_numbers = #tpu.dot_dimension_numbers<[1], [0], [0], [1], [0, 0, 1, 1], [], []>} : vector<256x8xf32>, vector<8x128xf32>, vector<256x128xf32> -> vector<256x128xf32>
    %c0_47 = arith.constant 0 : index
    %c0_48 = arith.constant 0 : index
    %32 = vector.load %arg6[%c0_47, %c0_48] : memref<256x128xf32, #tpu.memory_space<vmem>>, vector<256x128xf32>
    %33 = arith.addf %32, %31 : vector<256x128xf32>
    %c0_49 = arith.constant 0 : index
    %c0_50 = arith.constant 0 : index
    %34 = vector.load %arg6[%c0_49, %c0_50] : memref<256x128xf32, #tpu.memory_space<vmem>>, vector<256x128xf32>
    tpu.vector_store %arg6[%c0_49, %c0_50], %33 {strides = array<i32>} : memref<256x128xf32, #tpu.memory_space<vmem>>, vector<256x128xf32>,
    %c1_51 = arith.constant 1 : index
    %c1_52 = arith.constant 1 : index
    %c0_53 = arith.constant 0 : index
    %35 = vector.load %arg5[%c1_51, %c1_52, %c0_53] : memref<18x18x8xf32, #tpu.memory_space<vmem>>, vector<16x16x8xf32>
    %36 = vector.shape_cast %35 : vector<16x16x8xf32> to vector<256x8xf32>
    %c32 = arith.constant 32 : index
    %c0_54 = arith.constant 0 : index
    %37 = vector.load %arg2[%c32, %c0_54] : memref<72x128xf32, #tpu.memory_space<vmem>>, vector<8x128xf32>
    %cst_55 = arith.constant dense<0.000000e+00> : vector<256x128xf32>
    %38 = tpu.matmul %36, %37, %cst_55 {dimension_numbers = #tpu.dot_dimension_numbers<[1], [0], [0], [1], [0, 0, 1, 1], [], []>} : vector<256x8xf32>, vector<8x128xf32>, vector<256x128xf32> -> vector<256x128xf32>
    %c0_56 = arith.constant 0 : index
    %c0_57 = arith.constant 0 : index
    %39 = vector.load %arg6[%c0_56, %c0_57] : memref<256x128xf32, #tpu.memory_space<vmem>>, vector<256x128xf32>
    %40 = arith.addf %39, %38 : vector<256x128xf32>
    %c0_58 = arith.constant 0 : index
    %c0_59 = arith.constant 0 : index
    %41 = vector.load %arg6[%c0_58, %c0_59] : memref<256x128xf32, #tpu.memory_space<vmem>>, vector<256x128xf32>
    tpu.vector_store %arg6[%c0_58, %c0_59], %40 {strides = array<i32>} : memref<256x128xf32, #tpu.memory_space<vmem>>, vector<256x128xf32>,
    %c1_60 = arith.constant 1 : index
    %c2_61 = arith.constant 2 : index
    %c0_62 = arith.constant 0 : index
    %42 = vector.load %arg5[%c1_60, %c2_61, %c0_62] : memref<18x18x8xf32, #tpu.memory_space<vmem>>, vector<16x16x8xf32>
    %43 = vector.shape_cast %42 : vector<16x16x8xf32> to vector<256x8xf32>
    %c40 = arith.constant 40 : index
    %c0_63 = arith.constant 0 : index
    %44 = vector.load %arg2[%c40, %c0_63] : memref<72x128xf32, #tpu.memory_space<vmem>>, vector<8x128xf32>
    %cst_64 = arith.constant dense<0.000000e+00> : vector<256x128xf32>
    %45 = tpu.matmul %43, %44, %cst_64 {dimension_numbers = #tpu.dot_dimension_numbers<[1], [0], [0], [1], [0, 0, 1, 1], [], []>} : vector<256x8xf32>, vector<8x128xf32>, vector<256x128xf32> -> vector<256x128xf32>
    %c0_65 = arith.constant 0 : index
    %c0_66 = arith.constant 0 : index
    %46 = vector.load %arg6[%c0_65, %c0_66] : memref<256x128xf32, #tpu.memory_space<vmem>>, vector<256x128xf32>
    %47 = arith.addf %46, %45 : vector<256x128xf32>
    %c0_67 = arith.constant 0 : index
    %c0_68 = arith.constant 0 : index
    %48 = vector.load %arg6[%c0_67, %c0_68] : memref<256x128xf32, #tpu.memory_space<vmem>>, vector<256x128xf32>
    tpu.vector_store %arg6[%c0_67, %c0_68], %47 {strides = array<i32>} : memref<256x128xf32, #tpu.memory_space<vmem>>, vector<256x128xf32>,
    %c2_69 = arith.constant 2 : index
    %c0_70 = arith.constant 0 : index
    %c0_71 = arith.constant 0 : index
    %49 = vector.load %arg5[%c2_69, %c0_70, %c0_71] : memref<18x18x8xf32, #tpu.memory_space<vmem>>, vector<16x16x8xf32>
    %50 = vector.shape_cast %49 : vector<16x16x8xf32> to vector<256x8xf32>
    %c48 = arith.constant 48 : index
    %c0_72 = arith.constant 0 : index
    %51 = vector.load %arg2[%c48, %c0_72] : memref<72x128xf32, #tpu.memory_space<vmem>>, vector<8x128xf32>
    %cst_73 = arith.constant dense<0.000000e+00> : vector<256x128xf32>
    %52 = tpu.matmul %50, %51, %cst_73 {dimension_numbers = #tpu.dot_dimension_numbers<[1], [0], [0], [1], [0, 0, 1, 1], [], []>} : vector<256x8xf32>, vector<8x128xf32>, vector<256x128xf32> -> vector<256x128xf32>
    %c0_74 = arith.constant 0 : index
    %c0_75 = arith.constant 0 : index
    %53 = vector.load %arg6[%c0_74, %c0_75] : memref<256x128xf32, #tpu.memory_space<vmem>>, vector<256x128xf32>
    %54 = arith.addf %53, %52 : vector<256x128xf32>
    %c0_76 = arith.constant 0 : index
    %c0_77 = arith.constant 0 : index
    %55 = vector.load %arg6[%c0_76, %c0_77] : memref<256x128xf32, #tpu.memory_space<vmem>>, vector<256x128xf32>
    tpu.vector_store %arg6[%c0_76, %c0_77], %54 {strides = array<i32>} : memref<256x128xf32, #tpu.memory_space<vmem>>, vector<256x128xf32>,
    %c2_78 = arith.constant 2 : index
    %c1_79 = arith.constant 1 : index
    %c0_80 = arith.constant 0 : index
    %56 = vector.load %arg5[%c2_78, %c1_79, %c0_80] : memref<18x18x8xf32, #tpu.memory_space<vmem>>, vector<16x16x8xf32>
    %57 = vector.shape_cast %56 : vector<16x16x8xf32> to vector<256x8xf32>
    %c56 = arith.constant 56 : index
    %c0_81 = arith.constant 0 : index
    %58 = vector.load %arg2[%c56, %c0_81] : memref<72x128xf32, #tpu.memory_space<vmem>>, vector<8x128xf32>
    %cst_82 = arith.constant dense<0.000000e+00> : vector<256x128xf32>
    %59 = tpu.matmul %57, %58, %cst_82 {dimension_numbers = #tpu.dot_dimension_numbers<[1], [0], [0], [1], [0, 0, 1, 1], [], []>} : vector<256x8xf32>, vector<8x128xf32>, vector<256x128xf32> -> vector<256x128xf32>
    %c0_83 = arith.constant 0 : index
    %c0_84 = arith.constant 0 : index
    %60 = vector.load %arg6[%c0_83, %c0_84] : memref<256x128xf32, #tpu.memory_space<vmem>>, vector<256x128xf32>
    %61 = arith.addf %60, %59 : vector<256x128xf32>
    %c0_85 = arith.constant 0 : index
    %c0_86 = arith.constant 0 : index
    %62 = vector.load %arg6[%c0_85, %c0_86] : memref<256x128xf32, #tpu.memory_space<vmem>>, vector<256x128xf32>
    tpu.vector_store %arg6[%c0_85, %c0_86], %61 {strides = array<i32>} : memref<256x128xf32, #tpu.memory_space<vmem>>, vector<256x128xf32>,
    %c2_87 = arith.constant 2 : index
    %c2_88 = arith.constant 2 : index
    %c0_89 = arith.constant 0 : index
    %63 = vector.load %arg5[%c2_87, %c2_88, %c0_89] : memref<18x18x8xf32, #tpu.memory_space<vmem>>, vector<16x16x8xf32>
    %64 = vector.shape_cast %63 : vector<16x16x8xf32> to vector<256x8xf32>
    %c64 = arith.constant 64 : index
    %c0_90 = arith.constant 0 : index
    %65 = vector.load %arg2[%c64, %c0_90] : memref<72x128xf32, #tpu.memory_space<vmem>>, vector<8x128xf32>
    %cst_91 = arith.constant dense<0.000000e+00> : vector<256x128xf32>
    %66 = tpu.matmul %64, %65, %cst_91 {dimension_numbers = #tpu.dot_dimension_numbers<[1], [0], [0], [1], [0, 0, 1, 1], [], []>} : vector<256x8xf32>, vector<8x128xf32>, vector<256x128xf32> -> vector<256x128xf32>
    %c0_92 = arith.constant 0 : index
    %c0_93 = arith.constant 0 : index
    %67 = vector.load %arg6[%c0_92, %c0_93] : memref<256x128xf32, #tpu.memory_space<vmem>>, vector<256x128xf32>
    %68 = arith.addf %67, %66 : vector<256x128xf32>
    %c0_94 = arith.constant 0 : index
    %c0_95 = arith.constant 0 : index
    %69 = vector.load %arg6[%c0_94, %c0_95] : memref<256x128xf32, #tpu.memory_space<vmem>>, vector<256x128xf32>
    tpu.vector_store %arg6[%c0_94, %c0_95], %68 {strides = array<i32>} : memref<256x128xf32, #tpu.memory_space<vmem>>, vector<256x128xf32>,
    %c0_96 = arith.constant 0 : index
    %c0_97 = arith.constant 0 : index
    %70 = vector.load %arg6[%c0_96, %c0_97] : memref<256x128xf32, #tpu.memory_space<vmem>>, vector<256x128xf32>
    %cst_98 = arith.constant dense<0.000000e+00> : vector<128xf32>
    %71 = vector.multi_reduction <add>, %70, %cst_98 [0] : vector<256x128xf32> to vector<128xf32>
    %72 = vector.shape_cast %71 : vector<128xf32> to vector<1x128xf32>
    %73 = arith.mulf %70, %70 : vector<256x128xf32>
    %cst_99 = arith.constant dense<0.000000e+00> : vector<128xf32>
    %74 = vector.multi_reduction <add>, %73, %cst_99 [0] : vector<256x128xf32> to vector<128xf32>
    %75 = vector.shape_cast %74 : vector<128xf32> to vector<1x128xf32>
    %76 = tpu.concatenate %72, %75 in 0 : vector<1x128xf32>, vector<1x128xf32> -> vector<2x128xf32>
    %c0_100 = arith.constant 0 : index
    %c0_101 = arith.constant 0 : index
    %c0_102 = arith.constant 0 : index
    %77 = vector.load %arg4[%c0_100, %c0_101, %c0_102] : memref<1x2x128xf32, #tpu.memory_space<vmem>>, vector<1x2x128xf32>
    %78 = vector.shape_cast %77 : vector<1x2x128xf32> to vector<2x128xf32>
    %79 = vector.shape_cast %76 : vector<2x128xf32> to vector<1x2x128xf32>
    tpu.vector_store %arg4[%c0_100, %c0_101, %c0_102], %79 {strides = array<i32>} : memref<1x2x128xf32, #tpu.memory_space<vmem>>, vector<1x2x128xf32>,
    %80 = vector.extract_strided_slice %70 {offsets = [0, 0], sizes = [256, 8], strides = [1, 1]} : vector<256x128xf32> to vector<256x8xf32>
    %81 = vector.shape_cast %80 : vector<256x8xf32> to vector<16x16x8xf32>
    %c0_103 = arith.constant 0 : index
    %c0_104 = arith.constant 0 : index
    %c0_105 = arith.constant 0 : index
    %c0_106 = arith.constant 0 : index
    %82 = vector.load %arg3[%c0_103, %c0_104, %c0_105, %c0_106] : memref<1x16x16x8xf32, #tpu.memory_space<vmem>>, vector<1x16x16x8xf32>
    %83 = vector.shape_cast %82 : vector<1x16x16x8xf32> to vector<16x16x8xf32>
    %84 = vector.shape_cast %81 : vector<16x16x8xf32> to vector<1x16x16x8xf32>
    tpu.vector_store %arg3[%c0_103, %c0_104, %c0_105, %c0_106], %84 {strides = array<i32>} : memref<1x16x16x8xf32, #tpu.memory_space<vmem>>, vector<1x16x16x8xf32>,
    return
  }
  func.func @transform_0(%arg0: i32) -> (i32, i32, i32, i32) {
    %c0_i32 = arith.constant 0 : i32
    %c0_i32_0 = arith.constant 0 : i32
    %c0_i32_1 = arith.constant 0 : i32
    %c0_i32_2 = arith.constant 0 : i32
    return %arg0, %c0_i32, %c0_i32_0, %c0_i32_1 : i32, i32, i32, i32
  }
  func.func @transform_1(%arg0: i32) -> (i32, i32) {
    %c0_i32 = arith.constant 0 : i32
    %c0_i32_0 = arith.constant 0 : i32
    %c0_i32_1 = arith.constant 0 : i32
    return %c0_i32, %c0_i32_0 : i32, i32
  }
  func.func @transform_2(%arg0: i32) -> (i32, i32, i32, i32) {
    %c0_i32 = arith.constant 0 : i32
    %c0_i32_0 = arith.constant 0 : i32
    %c0_i32_1 = arith.constant 0 : i32
    %c0_i32_2 = arith.constant 0 : i32
    return %arg0, %c0_i32, %c0_i32_0, %c0_i32_1 : i32, i32, i32, i32
  }
  func.func @transform_3(%arg0: i32) -> (i32, i32, i32) {
    %c0_i32 = arith.constant 0 : i32
    %c0_i32_0 = arith.constant 0 : i32
    %c0_i32_1 = arith.constant 0 : i32
    return %arg0, %c0_i32, %c0_i32_0 : i32, i32, i32
  }
}

</mosaic_0001>

<bundles_post_ra>
// kernel: tpu_custom_call.1
= control target key start
LH: loop header
LB: loop body
LE: loop exit
PB: predicated region body
PF: predicated region fallthrough
CT: control target
= control target key end

     0   :  { %9 = vsyncpa [#allocation5], 0  ;;  %s7105_s0 = inlined_call_operand.vmem [shape: f32[2,16,16,8], index: 0, kind: input, shape index: {}]   ;;  %s7106_s1 = inlined_call_operand.vmem [shape: f32[72,128], index: 1, kind: input, shape index: {}]   ;;  %s7107_s2 = inlined_call_operand.vmem [shape: f32[2,16,16,8], index: 2, kind: output, shape index: {0}]   ;;  %s7108_s3 = inlined_call_operand.hbm [shape: f32[2,2,128], index: 3, kind: output, shape index: {1}]  }
   0x1   :  { %11 = vsyncpa [#allocation5 + $0x1], 0  ;;  %s5993_s12 = smov 0   ;;  %s5995_s13 = smov 0  }
   0x2   :  { %s5997_s14 = smov 0   ;;  %s5999_s15 = smov 0  }
   0x3 LB: > { %s6014_s16 = sadd.s32 4294967295, %s5969_s15   ;;  %s4559_s17 = sadd.s32 4294967294, %s5969_s15   ;;  %s5969_s15 = sphi %s5999_s15, %s7228_s15   ;;  %s5965_s14 = sphi %s5997_s14, %s7227_s14   ;;  %s5961_s13 = sphi %s5995_s13, %s7226_s13   ;;  %s5957_s12 = sphi %s5993_s12, %s7225_s12  }
   0x4   : > { %s6018_s18 = sadd.s32 1, %s5969_s15   ;;  %s97_s19 = sadd.s32 1, %s5965_s14 }
   0x5   : > { %s94_s20 = ssub.s32 %s5969_s15, %s6018_s18  ;;  %p107_p0 = scmp.ne.s32.totalorder %s5965_s14, %s5961_s13 }
   0x6   : > { %p95_p1 = scmp.eq.s32.totalorder %s94_s20, 0  ;;  %p108_p2 = scmp.eq.s32.totalorder %s6014_s16, 1 }
   0x7   : > { %p113_p3 = scmp.ne.s32.totalorder %s5961_s13, %s5957_s12  ;;  %p114_p4 = scmp.eq.s32.totalorder %s4559_s17, 1 }
   0x8   : > { %s6029_s21 = scalar_select %p95_p1, %s5965_s14, %s97_s19  }
   0x9   : > { %p6031_p5 = por %p108_p2, %p107_p0  ;;  %p6035_p6 = por %p114_p4, %p113_p3 }
   0xa   : > { %p4562_p7 = scmp.ge.s32.totalorder %s5969_s15, 1  ;;  %p143_p8 = scmp.lt.s32.totalorder %s5969_s15, 3 }
   0xc   : > { %p144_p9 = pnand %p4562_p7, %p143_p8 }
   0xe   : > { %147 = sbr.rel (%p144_p9) target bundleno = 585 (0x249), region = 28 }
  0x15   : > { %v325_v0 = vld [vmem:[%s7106_s1] sm:$0xff]  ;;  %vm182_vm0 = vcmask 64512   ;;  %vm191_vm1 = vcmask 57344   ;;  %p172_p10 = scmp.lt.s32.totalorder %s6014_s16, 1  ;;  %v5971_v2 = vmov 0.0   ;;  %v711_v3 = vld [vmem:[%s7106_s1 + $0x8] sm:$0xff] }
  0x16   : > { %v6047_v1 = vld [vmem:[%s7106_s1 + $0x20] sm:$0xff]  ;;  %5159 = vmatprep.subr.mxu1 %v325_v0  ;;  %183 = vst.msk [vmem:[#allocation2] sm:$0xff] %vm182_vm0, %v5971_v2  ;;  %184 = vst.msk [vmem:[#allocation2 + $0x8] sm:$0xff] %vm182_vm0, %v5971_v2  ;;  %v6093_v4 = vld [vmem:[%s7106_s1 + $0x28] sm:$0xff]  ;;  %vm185_vm2 = vcmask 58368   ;;  %s4857_s7 = sshll.u32 %s6014_s16, 5 }
  0x17   : > { %188 = vst.msk [vmem:[#allocation2 + $0x198] sm:$0xff] %vm182_vm0, %v5971_v2  ;;  %189 = vst.msk [vmem:[#allocation2 + $0x1a0] sm:$0xff] %vm182_vm0, %v5971_v2  ;;  %5359 = vmatprep.subr.mxu0 %v6047_v1  ;;  %5160 = vmatpush3.msra.mxu1 %v325_v0  ;;  %s6101_s5 = scalar_select %p172_p10, %s6014_s16, 1  ;;  %v6131_v14 = vld [vmem:[%s7106_s1 + $0x10] sm:$0xff]  ;;  %vm4418_vm3 = vcmask 1040384  }
  0x18   : > { %193 = vst.msk [vmem:[#allocation2 + $0x18] sm:$0x1] %vm191_vm1, %v5971_v2  ;;  %194 = vst.msk [vmem:[#allocation2 + $0x30] sm:$0x1] %vm191_vm1, %v5971_v2  ;;  %5360 = vmatpush3.msra.mxu0 %v6047_v1  ;;  %5209 = vmatprep.subr.mxu1 %v711_v3  ;;  %v6160_v27 = vld [vmem:[%s7106_s1 + $0x30] sm:$0xff]  ;;  %s7063_s17 = scalar_lea.hbm %s7108_s3, %s4857_s7  ;;  %s5972_s16 = smov [#allocation4]  }
  0x19   : > { %195 = vst.msk [vmem:[#allocation2 + $0x48] sm:$0x1] %vm191_vm1, %v5971_v2  ;;  %196 = vst.msk [vmem:[#allocation2 + $0x60] sm:$0x1] %vm191_vm1, %v5971_v2  ;;  %5409 = vmatprep.subr.mxu0 %v6093_v4  ;;  %s4860_s6 = sshll.u32 %s6101_s5, 8  ;;  %s169_s5 = sand.u32 1, %s5961_s13  }
  0x1a   : > { %197 = vst.msk [vmem:[#allocation2 + $0x78] sm:$0x1] %vm191_vm1, %v5971_v2  ;;  %198 = vst.msk [vmem:[#allocation2 + $0x90] sm:$0x1] %vm191_vm1, %v5971_v2  ;;  %s6112_s9 = scalar_lea.vmem %s7105_s0, %s4860_s6  ;;  %s6987_s4 = scalar_lea.vmem %s7107_s2, %s4860_s6 }
  0x1b   : > { %199 = vst.msk [vmem:[#allocation2 + $0xa8] sm:$0x1] %vm191_vm1, %v5971_v2  ;;  %200 = vst.msk [vmem:[#allocation2 + $0xc0] sm:$0x1] %vm191_vm1, %v5971_v2  ;;  %v228_v5 = vld [vmem:[%s6112_s9] sm:$0xff]  ;;  %v229_v6 = vld [vmem:[%s6112_s9 + $0x8] sm:$0xff] }
  0x1c   : > { %201 = vst.msk [vmem:[#allocation2 + $0xd8] sm:$0x1] %vm191_vm1, %v5971_v2  ;;  %202 = vst.msk [vmem:[#allocation2 + $0xf0] sm:$0x1] %vm191_vm1, %v5971_v2  ;;  %v230_v7 = vld [vmem:[%s6112_s9 + $0x10] sm:$0xff]  ;;  %v231_v8 = vld [vmem:[%s6112_s9 + $0x18] sm:$0xff] }
  0x1d   : > { %203 = vst.msk [vmem:[#allocation2 + $0x108] sm:$0x1] %vm191_vm1, %v5971_v2  ;;  %204 = vst.msk [vmem:[#allocation2 + $0x120] sm:$0x1] %vm191_vm1, %v5971_v2  ;;  %v232_v9 = vld [vmem:[%s6112_s9 + $0x20] sm:$0xff]  ;;  %v233_v10 = vld [vmem:[%s6112_s9 + $0x28] sm:$0xff] }
  0x1e   : > { %205 = vst.msk [vmem:[#allocation2 + $0x138] sm:$0x1] %vm191_vm1, %v5971_v2  ;;  %206 = vst.msk [vmem:[#allocation2 + $0x150] sm:$0x1] %vm191_vm1, %v5971_v2  ;;  %v294_v11 = vld [vmem:[#allocation2 + $0x8] sm:$0xff]  ;;  %v234_v12 = vld [vmem:[%s6112_s9 + $0x30] sm:$0xff] }
  0x1f   : > { %207 = vst.msk [vmem:[#allocation2 + $0x168] sm:$0x1] %vm191_vm1, %v5971_v2  ;;  %208 = vst.msk [vmem:[#allocation2 + $0x180] sm:$0x1] %vm191_vm1, %v5971_v2  ;;  %v235_v13 = vld [vmem:[%s6112_s9 + $0x38] sm:$0xff]  ;;  %v236_v16 = vld [vmem:[%s6112_s9 + $0x40] sm:$0xff] }
  0x20   : > { %211 = vst.msk [vmem:[#allocation2 + $0x29] sm:$0x1] %vm191_vm1, %v5971_v2  ;;  %212 = vst.msk [vmem:[#allocation2 + $0x41] sm:$0x1] %vm191_vm1, %v5971_v2  ;;  %v237_v17 = vld [vmem:[%s6112_s9 + $0x48] sm:$0xff]  ;;  %v238_v18 = vld [vmem:[%s6112_s9 + $0x50] sm:$0xff] }
  0x21   : > { %213 = vst.msk [vmem:[#allocation2 + $0x59] sm:$0x1] %vm191_vm1, %v5971_v2  ;;  %214 = vst.msk [vmem:[#allocation2 + $0x71] sm:$0x1] %vm191_vm1, %v5971_v2  ;;  %v239_v19 = vld [vmem:[%s6112_s9 + $0x58] sm:$0xff]  ;;  %v240_v20 = vld [vmem:[%s6112_s9 + $0x60] sm:$0xff] }
  0x22   : > { %215 = vst.msk [vmem:[#allocation2 + $0x89] sm:$0x1] %vm191_vm1, %v5971_v2  ;;  %216 = vst.msk [vmem:[#allocation2 + $0xa1] sm:$0x1] %vm191_vm1, %v5971_v2  ;;  %v241_v21 = vld [vmem:[%s6112_s9 + $0x68] sm:$0xff]  ;;  %v242_v22 = vld [vmem:[%s6112_s9 + $0x70] sm:$0xff] }
  0x23   : > { %217 = vst.msk [vmem:[#allocation2 + $0xb9] sm:$0x1] %vm191_vm1, %v5971_v2  ;;  %218 = vst.msk [vmem:[#allocation2 + $0xd1] sm:$0x1] %vm191_vm1, %v5971_v2  ;;  %v243_v23 = vld [vmem:[%s6112_s9 + $0x78] sm:$0xff]  ;;  %v244_v24 = vld [vmem:[%s6112_s9 + $0x80] sm:$0xff] }
  0x24   : > { %219 = vst.msk [vmem:[#allocation2 + $0xe9] sm:$0x1] %vm191_vm1, %v5971_v2  ;;  %220 = vst.msk [vmem:[#allocation2 + $0x101] sm:$0x1] %vm191_vm1, %v5971_v2  ;;  %v245_v25 = vld [vmem:[%s6112_s9 + $0x88] sm:$0xff]  ;;  %v246_v26 = vld [vmem:[%s6112_s9 + $0x90] sm:$0xff] }
  0x25   : > { %221 = vst.msk [vmem:[#allocation2 + $0x119] sm:$0x1] %vm191_vm1, %v5971_v2  ;;  %222 = vst.msk [vmem:[#allocation2 + $0x131] sm:$0x1] %vm191_vm1, %v5971_v2  ;;  %v247_v28 = vld [vmem:[%s6112_s9 + $0x98] sm:$0xff]  ;;  %v248_v29 = vld [vmem:[%s6112_s9 + $0xa0] sm:$0xff] }
  0x26   : > { %223 = vst.msk [vmem:[#allocation2 + $0x149] sm:$0x1] %vm191_vm1, %v5971_v2  ;;  %224 = vst.msk [vmem:[#allocation2 + $0x161] sm:$0x1] %vm191_vm1, %v5971_v2  ;;  %v249_v30 = vld [vmem:[%s6112_s9 + $0xa8] sm:$0xff]  ;;  %v250_v50 = vld [vmem:[%s6112_s9 + $0xb0] sm:$0xff] }
  0x27   : > { %225 = vst.msk [vmem:[#allocation2 + $0x179] sm:$0x1] %vm191_vm1, %v5971_v2  ;;  %226 = vst.msk [vmem:[#allocation2 + $0x191] sm:$0x1] %vm191_vm1, %v5971_v2  ;;  %v251_v53 = vld [vmem:[%s6112_s9 + $0xb8] sm:$0xff]  ;;  %v252_v55 = vld [vmem:[%s6112_s9 + $0xc0] sm:$0xff] }
  0x28   : > { %192 = vst.msk [vmem:[#allocation2] sm:$0x1] %vm191_vm1, %v5971_v2  ;;  %209 = vst.msk [vmem:[#allocation2 + $0x198] sm:$0x1] %vm191_vm1, %v5971_v2  ;;  %v253_v56 = vld [vmem:[%s6112_s9 + $0xc8] sm:$0xff]  ;;  %v254_v57 = vld [vmem:[%s6112_s9 + $0xd0] sm:$0xff] }
  0x29   : > { %186 = vst.msk [vmem:[#allocation2 + $0x10] sm:$0x3] %vm185_vm2, %v5971_v2  ;;  %190 = vst.msk [vmem:[#allocation2 + $0x1a8] sm:$0x3] %vm185_vm2, %v5971_v2  ;;  %v255_v58 = vld [vmem:[%s6112_s9 + $0xd8] sm:$0xff]  ;;  %v256_v59 = vld [vmem:[%s6112_s9 + $0xe0] sm:$0xff] }
  0x2a   : > { %210 = vst.msk [vmem:[#allocation2 + $0x11] sm:$0x1] %vm191_vm1, %v5971_v2  ;;  %227 = vst.msk [vmem:[#allocation2 + $0x1a9] sm:$0x1] %vm191_vm1, %v5971_v2  ;;  %v257_v62 = vld [vmem:[%s6112_s9 + $0xe8] sm:$0xff]  ;;  %s4563_s6 = sshll.u32 %s169_s5, 1 }
  0x2b   : > { %261 = vst.msk [vmem:[#allocation2 + $0x19] sm:$0xff] %vm182_vm0, %v228_v5  ;;  %262 = vst.msk [vmem:[#allocation2 + $0x21] sm:$0xff] %vm182_vm0, %v229_v6  ;;  %s171_s8 = scalar_lea.vmem [#allocation4], %s4563_s6  ;;  %s4459_s19 = scalar_lea.sflag [#allocation5], %s169_s5 }
  0x2c   : > { %263 = vst.msk [vmem:[#allocation2 + $0x31] sm:$0xff] %vm182_vm0, %v230_v7  ;;  %264 = vst.msk [vmem:[#allocation2 + $0x39] sm:$0xff] %vm182_vm0, %v231_v8  ;;  %s5911_s24 = sshll.u32 %s5972_s16, 4  ;;  %s5912_s24 = int_to_ptr.vmem [resolvable:$false] %s5911_s24 }
  0x2d   : > { %265 = vst.msk [vmem:[#allocation2 + $0x49] sm:$0xff] %vm182_vm0, %v232_v9  ;;  %266 = vst.msk [vmem:[#allocation2 + $0x51] sm:$0xff] %vm182_vm0, %v233_v10  ;;  %v258_v10 = vld [vmem:[%s6112_s9 + $0xf0] sm:$0xff]  ;;  %s5913_s25 = scalar_lea.vmem %s5912_s24, 64 }
  0x2e   : > { %267 = vst.msk [vmem:[#allocation2 + $0x61] sm:$0xff] %vm182_vm0, %v234_v12  ;;  %268 = vst.msk [vmem:[#allocation2 + $0x69] sm:$0xff] %vm182_vm0, %v235_v13 }
  0x2f   : > { %v293_v15 = vld [vmem:[#allocation2] sm:$0xff]  ;;  %269 = vst.msk [vmem:[#allocation2 + $0x79] sm:$0xff] %vm182_vm0, %v236_v16  ;;  %270 = vst.msk [vmem:[#allocation2 + $0x81] sm:$0xff] %vm182_vm0, %v237_v17  ;;  %v6340_v17 = vld [vmem:[%s7106_s1 + $0x38] sm:$0xff] }
  0x30   : > { %5161 = vmatprep.mubr.msk.f32.mxu1 %vm182_vm0, %v293_v15  ;;  %271 = vst.msk [vmem:[#allocation2 + $0x91] sm:$0xff] %vm182_vm0, %v238_v18  ;;  %272 = vst.msk [vmem:[#allocation2 + $0x99] sm:$0xff] %vm182_vm0, %v239_v19 }
  0x31   : > { %5162 = vmatmul.mubr.msk.f32.vlgmr.msra.gmra.mrb[0].mxu1 %vm182_vm0, %v294_v11  ;;  %273 = vst.msk [vmem:[#allocation2 + $0xa9] sm:$0xff] %vm182_vm0, %v240_v20  ;;  %274 = vst.msk [vmem:[#allocation2 + $0xb1] sm:$0xff] %vm182_vm0, %v241_v21  ;;  %v259_v11 = vld [vmem:[%s6112_s9 + $0xf8] sm:$0xff]  ;;  %s4475_s9 = sshll.u32 %s171_s8, 4  ;;  %s7065_s9 = int_to_ptr.vmem [resolvable:$true] %s4475_s9 }
  0x32   : > { %5210 = vmatpush3.msra.mxu1 %v711_v3  ;;  %275 = vst.msk [vmem:[#allocation2 + $0xc1] sm:$0xff] %vm182_vm0, %v242_v22  ;;  %276 = vst.msk [vmem:[#allocation2 + $0xc9] sm:$0xff] %vm182_vm0, %v243_v23  ;;  %v6168_v31 = vld [vmem:[#allocation2 + $0x18] sm:$0xff]  ;;  %v6172_v33 = vld [vmem:[#allocation2 + $0x20] sm:$0xff]  ;;  %s5907_s20 = scalar_lea.vmem %s7065_s9, 32  ;;  %p5914_p0 = scmp.lt.s32.totalorder %s7065_s9, %s5912_s24 }
  0x33   : > { %277 = vst.msk [vmem:[#allocation2 + $0xd9] sm:$0xff] %vm182_vm0, %v244_v24  ;;  %278 = vst.msk [vmem:[#allocation2 + $0xe1] sm:$0xff] %vm182_vm0, %v245_v25  ;;  %5259 = vmatprep.subr.mxu1 %v6131_v14  ;;  %v6170_v32 = vld [vmem:[#allocation2 + $0x19] sm:$0xff]  ;;  %5164 = vmatprep.mubr.msk.f32.mxu1 %vm182_vm0, %v6168_v31  ;;  %v6181_v34 = vld [vmem:[#allocation2 + $0x21] sm:$0xff]  ;;  %p5908_p11 = scmp.ne.s32.totalorder %s7065_s9, %s5907_s20  ;;  %p5915_p1 = scmp.lt.s32.totalorder %s5913_s25, %s5907_s20 }
  0x34   : > { %279 = vst.msk [vmem:[#allocation2 + $0xf1] sm:$0xff] %vm182_vm0, %v246_v26  ;;  %7158 = vst [vmem:[#allocation7_spill] sm:$0xff] %v6168_v31  ;;  %5361 = vmatprep.mubr.msk.f32.mxu0 %vm182_vm0, %v6170_v32  ;;  %v6183_v35 = vld [vmem:[#allocation2 + $0x30] sm:$0xff]  ;;  %v6194_v37 = vld [vmem:[#allocation2 + $0x38] sm:$0xff] }
  0x35   : > { %7159 = vst [vmem:[#allocation8_spill] sm:$0xff] %v6172_v33  ;;  %280 = vst.msk [vmem:[#allocation2 + $0xf9] sm:$0xff] %vm182_vm0, %v247_v28  ;;  %v6185_v36 = vld [vmem:[#allocation2 + $0x31] sm:$0xff]  ;;  %5165 = vmatmul.mubr.msk.f32.gmra.mrb[2].mxu1 %vm182_vm0, %v6172_v33  ;;  %5362 = vmatmul.mubr.msk.f32.vlgmr.msra.gmra.mrb[0].mxu0 %vm182_vm0, %v6181_v34  ;;  %v6196_v38 = vld [vmem:[#allocation2 + $0x39] sm:$0xff]  ;;  %p5909_p12 = pnand %p5908_p11, %p6031_p5  ;;  %p5916_p2 = por %p5915_p1, %p5914_p0 }
  0x36   : > { %281 = vst.msk [vmem:[#allocation2 + $0x109] sm:$0xff] %vm182_vm0, %v248_v29  ;;  %282 = vst.msk [vmem:[#allocation2 + $0x111] sm:$0xff] %vm182_vm0, %v249_v30  ;;  %5410 = vmatpush3.msra.mxu0 %v6093_v4  ;;  %5167 = vmatprep.mubr.msk.f32.mxu1 %vm182_vm0, %v6183_v35  ;;  %v6200_v39 = vld [vmem:[#allocation2 + $0x48] sm:$0xff]  ;;  %v6213_v41 = vld [vmem:[#allocation2 + $0x50] sm:$0xff] }
  0x37   : > { %7160 = vst [vmem:[#allocation9_spill] sm:$0xff] %v6183_v35  ;;  %7161 = vst [vmem:[#allocation10_spill] sm:$0xff] %v6194_v37  ;;  %5364 = vmatprep.mubr.msk.f32.mxu0 %vm182_vm0, %v6185_v36  ;;  %v6202_v40 = vld [vmem:[#allocation2 + $0x49] sm:$0xff]  ;;  %5459 = vmatprep.subr.mxu0 %v6160_v27  ;;  %v6215_v42 = vld [vmem:[#allocation2 + $0x51] sm:$0xff]  ;;  %p5910_p13 = pneg %p5909_p12 }
  0x38   : > { %7162 = vst [vmem:[#allocation11_spill] sm:$0xff] %v6202_v40  ;;  %7163 = vst [vmem:[#allocation12_spill] sm:$0xff] %v6213_v41  ;;  %v6217_v43 = vld [vmem:[#allocation2 + $0x60] sm:$0xff]  ;;  %v6229_v45 = vld [vmem:[#allocation2 + $0x68] sm:$0xff] }
  0x39   : > { %5168 = vmatmul.mubr.msk.f32.gmra.mrb[4].mxu1 %vm182_vm0, %v6194_v37  ;;  %5365 = vmatmul.mubr.msk.f32.gmra.mrb[2].mxu0 %vm182_vm0, %v6196_v38  ;;  %v6219_v44 = vld [vmem:[#allocation2 + $0x61] sm:$0xff]  ;;  %7165 = vst [vmem:[#allocation14_spill] sm:$0xff] %v6229_v45  ;;  %v6231_v46 = vld [vmem:[#allocation2 + $0x69] sm:$0xff]  ;;  %v6233_v47 = vld [vmem:[#allocation2 + $0x78] sm:$0xff]  ;;  %p5917_p3 = pnand %p5916_p2, %p5910_p13 }
  0x3a   : > { %5170 = vmatprep.mubr.msk.f32.mxu1 %vm182_vm0, %v6200_v39  ;;  %5367 = vmatprep.mubr.msk.f32.mxu0 %vm182_vm0, %v6202_v40  ;;  %7164 = vst [vmem:[#allocation13_spill] sm:$0xff] %v6219_v44  ;;  %v6235_v48 = vld [vmem:[#allocation2 + $0x79] sm:$0xff]  ;;  %v6248_v51 = vld [vmem:[#allocation2 + $0x81] sm:$0xff]  ;;  %v6250_v52 = vld [vmem:[#allocation2 + $0x90] sm:$0xff] }
  0x3b   : > { %7166 = vst [vmem:[#allocation15_spill] sm:$0xff] %v6235_v48  ;;  %v6241_v49 = vld [vmem:[#allocation2 + $0x80] sm:$0xff]  ;;  %283 = vst.msk [vmem:[#allocation2 + $0x121] sm:$0xff] %vm182_vm0, %v250_v50  ;;  %v6254_v54 = vld [vmem:[#allocation2 + $0x91] sm:$0xff] }
  0x3c   : > { %7167 = vst [vmem:[#allocation16_spill] sm:$0xff] %v6241_v49  ;;  %7168 = vst [vmem:[#allocation17_spill] sm:$0xff] %v6254_v54  ;;  %v6273_v60 = vld [vmem:[#allocation2 + $0x98] sm:$0xff]  ;;  %v6280_v63 = vld [vmem:[#allocation2 + $0xa8] sm:$0xff] }
  0x3d   : > { %5171 = vmatmul.mubr.msk.f32.gmra.mrb[6].mxu1 %vm182_vm0, %v6213_v41  ;;  %5368 = vmatmul.mubr.msk.f32.gmra.mrb[4].mxu0 %vm182_vm0, %v6215_v42  ;;  %284 = vst.msk [vmem:[#allocation2 + $0x129] sm:$0xff] %vm182_vm0, %v251_v53  ;;  %285 = vst.msk [vmem:[#allocation2 + $0x139] sm:$0xff] %vm182_vm0, %v252_v55  ;;  %v6275_v61 = vld [vmem:[#allocation2 + $0x99] sm:$0xff]  ;;  %v6282_v0 = vld [vmem:[#allocation2 + $0xa9] sm:$0xff] }
  0x3e   : > { %5173 = vmatprep.mubr.msk.f32.mxu1 %vm182_vm0, %v6217_v43  ;;  %5370 = vmatprep.mubr.msk.f32.mxu0 %vm182_vm0, %v6219_v44  ;;  %286 = vst.msk [vmem:[#allocation2 + $0x141] sm:$0xff] %vm182_vm0, %v253_v56  ;;  %287 = vst.msk [vmem:[#allocation2 + $0x151] sm:$0xff] %vm182_vm0, %v254_v57  ;;  %v6293_v2 = vld [vmem:[#allocation2 + $0xb0] sm:$0xff]  ;;  %v6297_v4 = vld [vmem:[#allocation2 + $0xc0] sm:$0xff] }
  0x3f   : > { %7169 = vst [vmem:[#allocation18_spill] sm:$0xff] %v6273_v60  ;;  %288 = vst.msk [vmem:[#allocation2 + $0x159] sm:$0xff] %vm182_vm0, %v255_v58  ;;  %v6295_v3 = vld [vmem:[#allocation2 + $0xb1] sm:$0xff]  ;;  %v6299_v5 = vld [vmem:[#allocation2 + $0xc1] sm:$0xff] }
  0x40   : > { %289 = vst.msk [vmem:[#allocation2 + $0x169] sm:$0xff] %vm182_vm0, %v256_v59  ;;  %7170 = vst [vmem:[#allocation19_spill] sm:$0xff] %v6282_v0  ;;  %v6309_v6 = vld [vmem:[#allocation2 + $0xc8] sm:$0xff]  ;;  %v6313_v8 = vld [vmem:[#allocation2 + $0xd8] sm:$0xff] }
  0x41   : > { %5174 = vmatmul.mubr.msk.f32.gmra.mrb[8].mxu1 %vm182_vm0, %v6229_v45  ;;  %5371 = vmatmul.mubr.msk.f32.gmra.mrb[6].mxu0 %vm182_vm0, %v6231_v46  ;;  %290 = vst.msk [vmem:[#allocation2 + $0x171] sm:$0xff] %vm182_vm0, %v257_v62  ;;  %7171 = vst [vmem:[#allocation20_spill] sm:$0xff] %v6293_v2  ;;  %v6311_v7 = vld [vmem:[#allocation2 + $0xc9] sm:$0xff]  ;;  %v6315_v9 = vld [vmem:[#allocation2 + $0x1a] sm:$0xff] }
  0x42   : > { %5176 = vmatprep.mubr.msk.f32.mxu1 %vm182_vm0, %v6233_v47  ;;  %5373 = vmatprep.mubr.msk.f32.mxu0 %vm182_vm0, %v6235_v48  ;;  %7172 = vst [vmem:[#allocation21_spill] sm:$0xff] %v6299_v5  ;;  %291 = vst.msk [vmem:[#allocation2 + $0x181] sm:$0xff] %vm182_vm0, %v258_v10  ;;  %v6329_v12 = vld [vmem:[#allocation2 + $0xe0] sm:$0xff]  ;;  %v6333_v15 = vld [vmem:[#allocation2 + $0xf0] sm:$0xff] }
  0x43   : > { %292 = vst.msk [vmem:[#allocation2 + $0x189] sm:$0xff] %vm182_vm0, %v259_v11  ;;  %v6331_v13 = vld [vmem:[#allocation2 + $0x22] sm:$0xff]  ;;  %v6335_v16 = vld [vmem:[#allocation2 + $0x32] sm:$0xff]  ;;  %v6351_v19 = vld [vmem:[#allocation2 + $0x3a] sm:$0xff] }
  0x44   : > { %v6349_v18 = vld [vmem:[#allocation2 + $0xf8] sm:$0xff]  ;;  %v6355_v20 = vld [vmem:[#allocation2 + $0x108] sm:$0xff]  ;;  %v6368_v22 = vld [vmem:[#allocation2 + $0x110] sm:$0xff] }
  0x45   : > { %5177 = vmatmul.mubr.msk.f32.gmra.mrb[10].mxu1 %vm182_vm0, %v6241_v49  ;;  %5374 = vmatmul.mubr.msk.f32.gmra.mrb[8].mxu0 %vm182_vm0, %v6248_v51  ;;  %v6357_v21 = vld [vmem:[#allocation2 + $0x4a] sm:$0xff]  ;;  %v6370_v23 = vld [vmem:[#allocation2 + $0x52] sm:$0xff]  ;;  %v6372_v24 = vld [vmem:[#allocation2 + $0x120] sm:$0xff] }
  0x46   : > { %5179 = vmatprep.mubr.msk.f32.mxu1 %vm182_vm0, %v6250_v52  ;;  %5376 = vmatprep.mubr.msk.f32.mxu0 %vm182_vm0, %v6254_v54  ;;  %v6374_v25 = vld [vmem:[#allocation2 + $0x62] sm:$0xff]  ;;  %v6388_v28 = vld [vmem:[#allocation2 + $0x138] sm:$0xff]  ;;  %v6404_v53 = vld [vmem:[#allocation2 + $0x150] sm:$0xff] }
  0x47   : > { %v6384_v26 = vld [vmem:[#allocation2 + $0x128] sm:$0xff]  ;;  %v6390_v29 = vld [vmem:[#allocation2 + $0x7a] sm:$0xff]  ;;  %v6406_v55 = vld [vmem:[#allocation2 + $0x92] sm:$0xff] }
  0x48   : > { %v6400_v30 = vld [vmem:[#allocation2 + $0x140] sm:$0xff]  ;;  %v6416_v56 = vld [vmem:[#allocation2 + $0x158] sm:$0xff]  ;;  %v6420_v58 = vld [vmem:[#allocation2 + $0x168] sm:$0xff] }
  0x49   : > { %5180 = vmatmul.mubr.msk.f32.gmra.mrb[12].mxu1 %vm182_vm0, %v6273_v60  ;;  %5377 = vmatmul.mubr.msk.f32.gmra.mrb[10].mxu0 %vm182_vm0, %v6275_v61  ;;  %v6402_v50 = vld [vmem:[#allocation2 + $0x82] sm:$0xff]  ;;  %7173 = vst [vmem:[#allocation22_spill] sm:$0xff] %v6416_v56  ;;  %v6418_v57 = vld [vmem:[#allocation2 + $0x9a] sm:$0xff]  ;;  %7175 = vst [vmem:[#allocation24_spill] sm:$0xff] %v6420_v58 }
  0x4a   : > { %5182 = vmatprep.mubr.msk.f32.mxu1 %vm182_vm0, %v6280_v63  ;;  %5379 = vmatprep.mubr.msk.f32.mxu0 %vm182_vm0, %v6282_v0  ;;  %7174 = vst [vmem:[#allocation23_spill] sm:$0xff] %v6418_v57  ;;  %v6422_v59 = vld [vmem:[#allocation2 + $0xaa] sm:$0xff]  ;;  %v6434_v10 = vld [vmem:[#allocation2 + $0xb2] sm:$0xff]  ;;  %v679_v11 = vld [vmem:[#allocation2 + $0x1] sm:$0xff] }
  0x4b   : > { %7176 = vst [vmem:[#allocation25_spill] sm:$0xff] %v6422_v59  ;;  %v6432_v62 = vld [vmem:[#allocation2 + $0x170] sm:$0xff]  ;;  %v6436_v33 = vld [vmem:[#allocation2 + $0xc2] sm:$0xff] }
  0x4c   : > { %7177 = vst [vmem:[#allocation26_spill] sm:$0xff] %v6432_v62  ;;  %7178 = vst [vmem:[#allocation27_spill] sm:$0xff] %v6436_v33  ;;  %v680_v31 = vld [vmem:[#allocation2 + $0x9] sm:$0xff] }
  0x4d   : > { %5183 = vmatmul.mubr.msk.f32.gmra.mrb[14].mxu1 %vm182_vm0, %v6293_v2  ;;  %5380 = vmatmul.mubr.msk.f32.gmra.mrb[12].mxu0 %vm182_vm0, %v6295_v3 }
  0x4e   : > { %5185 = vmatprep.mubr.msk.f32.mxu1 %vm182_vm0, %v6297_v4  ;;  %5382 = vmatprep.mubr.msk.f32.mxu0 %vm182_vm0, %v6299_v5 }
  0x51   : > { %5186 = vmatmul.mubr.msk.f32.gmra.mrb[16].mxu1 %vm182_vm0, %v6309_v6  ;;  %5383 = vmatmul.mubr.msk.f32.gmra.mrb[14].mxu0 %vm182_vm0, %v6311_v7 }
  0x52   : > { %5188 = vmatprep.mubr.msk.f32.mxu1 %vm182_vm0, %v6313_v8  ;;  %5411 = vmatprep.mubr.msk.f32.mxu0 %vm182_vm0, %v6315_v9 }
  0x55   : > { %5189 = vmatmul.mubr.msk.f32.gmra.mrb[18].mxu1 %vm182_vm0, %v6329_v12  ;;  %5412 = vmatmul.mubr.msk.f32.vlgmr.msra.gmra.mrb[0].mxu0 %vm182_vm0, %v6331_v13 }
  0x56   : > { %5460 = vmatpush3.msra.mxu0 %v6160_v27  ;;  %5191 = vmatprep.mubr.msk.f32.mxu1 %vm182_vm0, %v6333_v15  ;;  %v6386_v27 = vld [vmem:[#allocation2 + $0x6a] sm:$0xff] }
  0x57   : > { %5414 = vmatprep.mubr.msk.f32.mxu0 %vm182_vm0, %v6335_v16  ;;  %5509 = vmatprep.subr.mxu0 %v6340_v17 }
  0x59   : > { %5192 = vmatmul.mubr.msk.f32.gmra.mrb[20].mxu1 %vm182_vm0, %v6349_v18  ;;  %5415 = vmatmul.mubr.msk.f32.gmra.mrb[2].mxu0 %vm182_vm0, %v6351_v19 }
  0x5a   : > { %5194 = vmatprep.mubr.msk.f32.mxu1 %vm182_vm0, %v6355_v20  ;;  %5417 = vmatprep.mubr.msk.f32.mxu0 %vm182_vm0, %v6357_v21 }
  0x5d   : > { %5195 = vmatmul.mubr.msk.f32.gmra.mrb[22].mxu1 %vm182_vm0, %v6368_v22  ;;  %5418 = vmatmul.mubr.msk.f32.gmra.mrb[4].mxu0 %vm182_vm0, %v6370_v23 }
  0x5e   : > { %5197 = vmatprep.mubr.msk.f32.mxu1 %vm182_vm0, %v6372_v24  ;;  %5420 = vmatprep.mubr.msk.f32.mxu0 %vm182_vm0, %v6374_v25 }
  0x61   : > { %5198 = vmatmul.mubr.msk.f32.gmra.mrb[24].mxu1 %vm182_vm0, %v6384_v26  ;;  %5421 = vmatmul.mubr.msk.f32.gmra.mrb[6].mxu0 %vm182_vm0, %v6386_v27 }
  0x62   : > { %5200 = vmatprep.mubr.msk.f32.mxu1 %vm182_vm0, %v6388_v28  ;;  %5423 = vmatprep.mubr.msk.f32.mxu0 %vm182_vm0, %v6390_v29 }
  0x65   : > { %5201 = vmatmul.mubr.msk.f32.gmra.mrb[26].mxu1 %vm182_vm0, %v6400_v30  ;;  %5424 = vmatmul.mubr.msk.f32.gmra.mrb[8].mxu0 %vm182_vm0, %v6402_v50 }
  0x66   : > { %5203 = vmatprep.mubr.msk.f32.mxu1 %vm182_vm0, %v6404_v53  ;;  %5426 = vmatprep.mubr.msk.f32.mxu0 %vm182_vm0, %v6406_v55 }
  0x69   : > { %5204 = vmatmul.mubr.msk.f32.gmra.mrb[28].mxu1 %vm182_vm0, %v6416_v56  ;;  %5427 = vmatmul.mubr.msk.f32.gmra.mrb[10].mxu0 %vm182_vm0, %v6418_v57  ;;  %v6447_v57 = vld [vmem:[#allocation2 + $0xda] sm:$0xff] }
  0x6a   : > { %5206 = vmatprep.mubr.msk.f32.mxu1 %vm182_vm0, %v6420_v58  ;;  %5429 = vmatprep.mubr.msk.f32.mxu0 %vm182_vm0, %v6422_v59  ;;  %v6445_v59 = vld [vmem:[#allocation2 + $0xca] sm:$0xff] }
  0x6d   : > { %5207 = vmatmul.mubr.msk.f32.gmra.mrb[30].mxu1 %vm182_vm0, %v6432_v62  ;;  %5430 = vmatmul.mubr.msk.f32.gmra.mrb[12].mxu0 %vm182_vm0, %v6434_v10  ;;  %v6455_v62 = vld [vmem:[%s7106_s1 + $0x18] sm:$0xff] }
  0x6e   : > { %5211 = vmatprep.mubr.msk.f32.mxu1 %vm182_vm0, %v679_v11  ;;  %5432 = vmatprep.mubr.msk.f32.mxu0 %vm182_vm0, %v6436_v33  ;;  %v6461_v11 = vld [vmem:[#allocation2 + $0xe2] sm:$0xff]  ;;  %v6464_v33 = vld [vmem:[#allocation2 + $0xf2] sm:$0xff] }
  0x71   : > { %5212 = vmatmul.mubr.msk.f32.vlgmr.msra.gmra.mrb[0].mxu1 %vm182_vm0, %v680_v31  ;;  %5433 = vmatmul.mubr.msk.f32.gmra.mrb[14].mxu0 %vm182_vm0, %v6445_v59  ;;  %v6475_v31 = vld [vmem:[#allocation2 + $0xfa] sm:$0xff] }
  0x72   : > { %5214 = vmatprep.mubr.msk.f32.mxu1 %vm182_vm0, %v6170_v32  ;;  %5435 = vmatprep.mubr.msk.f32.mxu0 %vm182_vm0, %v6447_v57  ;;  %7179 = vst [vmem:[#allocation28_spill] sm:$0xff] %v6475_v31  ;;  %v6477_v32 = vld [vmem:[#allocation2 + $0x10a] sm:$0xff] }
  0x73   : > { %5260 = vmatpush3.msra.mxu1 %v6131_v14  ;;  %v6487_v14 = vld [vmem:[#allocation2 + $0x112] sm:$0xff] }
  0x74   : > { %5309 = vmatprep.subr.mxu1 %v6455_v62  ;;  %7180 = vst [vmem:[#allocation29_spill] sm:$0xff] %v6487_v14 }
  0x75   : > { %5215 = vmatmul.mubr.msk.f32.gmra.mrb[2].mxu1 %vm182_vm0, %v6181_v34  ;;  %5436 = vmatmul.mubr.msk.f32.gmra.mrb[16].mxu0 %vm182_vm0, %v6461_v11  ;;  %v6489_v34 = vld [vmem:[#allocation2 + $0x122] sm:$0xff] }
  0x76   : > { %5217 = vmatprep.mubr.msk.f32.mxu1 %vm182_vm0, %v6185_v36  ;;  %5438 = vmatprep.mubr.msk.f32.mxu0 %vm182_vm0, %v6464_v33 }
  0x79   : > { %5218 = vmatmul.mubr.msk.f32.gmra.mrb[4].mxu1 %vm182_vm0, %v6196_v38  ;;  %5439 = vmatmul.mubr.msk.f32.gmra.mrb[18].mxu0 %vm182_vm0, %v6475_v31  ;;  %v6499_v31 = vld [vmem:[#allocation2 + $0x12a] sm:$0xff] }
  0x7a   : > { %5220 = vmatprep.mubr.msk.f32.mxu1 %vm182_vm0, %v6202_v40  ;;  %5441 = vmatprep.mubr.msk.f32.mxu0 %vm182_vm0, %v6477_v32  ;;  %7181 = vst [vmem:[#allocation30_spill] sm:$0xff] %v6499_v31  ;;  %v6501_v40 = vld [vmem:[#allocation2 + $0x13a] sm:$0xff] }
  0x7d   : > { %5221 = vmatmul.mubr.msk.f32.gmra.mrb[6].mxu1 %vm182_vm0, %v6215_v42  ;;  %5442 = vmatmul.mubr.msk.f32.gmra.mrb[20].mxu0 %vm182_vm0, %v6487_v14  ;;  %v6511_v14 = vld [vmem:[#allocation2 + $0x142] sm:$0xff] }
  0x7e   : > { %5223 = vmatprep.mubr.msk.f32.mxu1 %vm182_vm0, %v6219_v44  ;;  %5444 = vmatprep.mubr.msk.f32.mxu0 %vm182_vm0, %v6489_v34  ;;  %7182 = vst [vmem:[#allocation31_spill] sm:$0xff] %v6511_v14  ;;  %v6513_v44 = vld [vmem:[#allocation2 + $0x152] sm:$0xff] }
  0x81   : > { %5224 = vmatmul.mubr.msk.f32.gmra.mrb[8].mxu1 %vm182_vm0, %v6231_v46  ;;  %5445 = vmatmul.mubr.msk.f32.gmra.mrb[22].mxu0 %vm182_vm0, %v6499_v31  ;;  %v6523_v31 = vld [vmem:[#allocation2 + $0x15a] sm:$0xff] }
  0x82   : > { %5226 = vmatprep.mubr.msk.f32.mxu1 %vm182_vm0, %v6235_v48  ;;  %5447 = vmatprep.mubr.msk.f32.mxu0 %vm182_vm0, %v6501_v40  ;;  %7183 = vst [vmem:[#allocation32_spill] sm:$0xff] %v6523_v31  ;;  %v6525_v48 = vld [vmem:[#allocation2 + $0x16a] sm:$0xff] }
  0x85   : > { %5227 = vmatmul.mubr.msk.f32.gmra.mrb[10].mxu1 %vm182_vm0, %v6248_v51  ;;  %5448 = vmatmul.mubr.msk.f32.gmra.mrb[24].mxu0 %vm182_vm0, %v6511_v14  ;;  %v6535_v14 = vld [vmem:[#allocation2 + $0x172] sm:$0xff] }
  0x86   : > { %5229 = vmatprep.mubr.msk.f32.mxu1 %vm182_vm0, %v6254_v54  ;;  %5450 = vmatprep.mubr.msk.f32.mxu0 %vm182_vm0, %v6513_v44  ;;  %7184 = vst [vmem:[#allocation33_spill] sm:$0xff] %v6535_v14  ;;  %v6537_v54 = vld [vmem:[#allocation2 + $0x182] sm:$0xff] }
  0x87   : > { %7185 = vst [vmem:[#allocation34_spill] sm:$0xff] %v6537_v54 }
  0x89   : > { %5230 = vmatmul.mubr.msk.f32.gmra.mrb[12].mxu1 %vm182_vm0, %v6275_v61  ;;  %5451 = vmatmul.mubr.msk.f32.gmra.mrb[26].mxu0 %vm182_vm0, %v6523_v31  ;;  %v6547_v31 = vld [vmem:[#allocation2 + $0x18a] sm:$0xff] }
  0x8a   : > { %5232 = vmatprep.mubr.msk.f32.mxu1 %vm182_vm0, %v6282_v0  ;;  %5453 = vmatprep.mubr.msk.f32.mxu0 %vm182_vm0, %v6525_v48  ;;  %7186 = vst [vmem:[#allocation35_spill] sm:$0xff] %v6547_v31  ;;  %v6549_v0 = vld [vmem:[#allocation2 + $0xd9] sm:$0xff] }
  0x8d   : > { %5233 = vmatmul.mubr.msk.f32.gmra.mrb[14].mxu1 %vm182_vm0, %v6295_v3  ;;  %5454 = vmatmul.mubr.msk.f32.gmra.mrb[28].mxu0 %vm182_vm0, %v6535_v14  ;;  %v6559_v14 = vld [vmem:[#allocation2 + $0xe1] sm:$0xff] }
  0x8e   : > { %5235 = vmatprep.mubr.msk.f32.mxu1 %vm182_vm0, %v6299_v5  ;;  %5456 = vmatprep.mubr.msk.f32.mxu0 %vm182_vm0, %v6537_v54  ;;  %v6561_v5 = vld [vmem:[#allocation2 + $0xf1] sm:$0xff]  ;;  %v6566_v54 = vld [vmem:[%s7106_s1 + $0x40] sm:$0xff] }
  0x91   : > { %5236 = vmatmul.mubr.msk.f32.gmra.mrb[16].mxu1 %vm182_vm0, %v6311_v7  ;;  %5457 = vmatmul.mubr.msk.f32.gmra.mrb[30].mxu0 %vm182_vm0, %v6547_v31  ;;  %v6575_v31 = vld [vmem:[#allocation2 + $0xf9] sm:$0xff] }
  0x92   : > { %5238 = vmatprep.mubr.msk.f32.mxu1 %vm182_vm0, %v6549_v0  ;;  %5461 = vmatprep.mubr.msk.f32.mxu0 %vm182_vm0, %v6183_v35  ;;  %v6579_v35 = vld [vmem:[#allocation2 + $0x109] sm:$0xff] }
  0x93   : > { %7187 = vst [vmem:[#allocation36_spill] sm:$0xff] %v6579_v35 }
  0x95   : > { %5239 = vmatmul.mubr.msk.f32.gmra.mrb[18].mxu1 %vm182_vm0, %v6559_v14  ;;  %5462 = vmatmul.mubr.msk.f32.vlgmr.msra.gmra.mrb[0].mxu0 %vm182_vm0, %v6194_v37  ;;  %v6592_v37 = vld [vmem:[#allocation2 + $0x121] sm:$0xff] }
  0x96   : > { %5510 = vmatpush3.msra.mxu0 %v6340_v17  ;;  %5241 = vmatprep.mubr.msk.f32.mxu1 %vm182_vm0, %v6561_v5  ;;  %v6590_v17 = vld [vmem:[#allocation2 + $0x111] sm:$0xff]  ;;  %7188 = vst [vmem:[#allocation37_spill] sm:$0xff] %v6592_v37 }
  0x97   : > { %5464 = vmatprep.mubr.msk.f32.mxu0 %vm182_vm0, %v6200_v39  ;;  %5559 = vmatprep.subr.mxu0 %v6566_v54 }
  0x99   : > { %5242 = vmatmul.mubr.msk.f32.gmra.mrb[20].mxu1 %vm182_vm0, %v6575_v31  ;;  %5465 = vmatmul.mubr.msk.f32.gmra.mrb[2].mxu0 %vm182_vm0, %v6213_v41  ;;  %v6602_v41 = vld [vmem:[#allocation2 + $0x129] sm:$0xff] }
  0x9a   : > { %5244 = vmatprep.mubr.msk.f32.mxu1 %vm182_vm0, %v6579_v35  ;;  %5467 = vmatprep.mubr.msk.f32.mxu0 %vm182_vm0, %v6217_v43  ;;  %v6604_v35 = vld [vmem:[#allocation2 + $0x139] sm:$0xff] }
  0x9b   : > { %7189 = vst [vmem:[#allocation38_spill] sm:$0xff] %v6604_v35 }
  0x9d   : > { %5245 = vmatmul.mubr.msk.f32.gmra.mrb[22].mxu1 %vm182_vm0, %v6590_v17  ;;  %5468 = vmatmul.mubr.msk.f32.gmra.mrb[4].mxu0 %vm182_vm0, %v6229_v45  ;;  %v6614_v45 = vld [vmem:[#allocation2 + $0x141] sm:$0xff] }
  0x9e   : > { %5247 = vmatprep.mubr.msk.f32.mxu1 %vm182_vm0, %v6592_v37  ;;  %5470 = vmatprep.mubr.msk.f32.mxu0 %vm182_vm0, %v6233_v47  ;;  %v6616_v37 = vld [vmem:[#allocation2 + $0x151] sm:$0xff] }
  0x9f   : > { %7190 = vst [vmem:[#allocation39_spill] sm:$0xff] %v6616_v37 }
  0xa1   : > { %5248 = vmatmul.mubr.msk.f32.gmra.mrb[24].mxu1 %vm182_vm0, %v6602_v41  ;;  %5471 = vmatmul.mubr.msk.f32.gmra.mrb[6].mxu0 %vm182_vm0, %v6241_v49  ;;  %v6626_v49 = vld [vmem:[#allocation2 + $0x159] sm:$0xff] }
  0xa2   : > { %5250 = vmatprep.mubr.msk.f32.mxu1 %vm182_vm0, %v6604_v35  ;;  %5473 = vmatprep.mubr.msk.f32.mxu0 %vm182_vm0, %v6250_v52  ;;  %v6628_v35 = vld [vmem:[#allocation2 + $0x169] sm:$0xff] }
  0xa5   : > { %5251 = vmatmul.mubr.msk.f32.gmra.mrb[26].mxu1 %vm182_vm0, %v6614_v45  ;;  %5474 = vmatmul.mubr.msk.f32.gmra.mrb[8].mxu0 %vm182_vm0, %v6273_v60  ;;  %v6638_v60 = vld [vmem:[#allocation2 + $0x171] sm:$0xff] }
  0xa6   : > { %5253 = vmatprep.mubr.msk.f32.mxu1 %vm182_vm0, %v6616_v37  ;;  %5476 = vmatprep.mubr.msk.f32.mxu0 %vm182_vm0, %v6280_v63  ;;  %v1129_v37 = vld [vmem:[#allocation2 + $0x2] sm:$0xff] }
  0xa9   : > { %5254 = vmatmul.mubr.msk.f32.gmra.mrb[28].mxu1 %vm182_vm0, %v6626_v49  ;;  %5477 = vmatmul.mubr.msk.f32.gmra.mrb[10].mxu0 %vm182_vm0, %v6293_v2  ;;  %v1130_v2 = vld [vmem:[#allocation2 + $0xa] sm:$0xff] }
  0xaa   : > { %5256 = vmatprep.mubr.msk.f32.mxu1 %vm182_vm0, %v6628_v35  ;;  %5479 = vmatprep.mubr.msk.f32.mxu0 %vm182_vm0, %v6297_v4 }
  0xad   : > { %5257 = vmatmul.mubr.msk.f32.gmra.mrb[30].mxu1 %vm182_vm0, %v6638_v60  ;;  %5480 = vmatmul.mubr.msk.f32.gmra.mrb[12].mxu0 %vm182_vm0, %v6309_v6 }
  0xae   : > { %5261 = vmatprep.mubr.msk.f32.mxu1 %vm182_vm0, %v1129_v37  ;;  %5482 = vmatprep.mubr.msk.f32.mxu0 %vm182_vm0, %v6313_v8  ;;  %v6696_v37 = vld [vmem:[#allocation2 + $0x180] sm:$0xff] }
  0xb1   : > { %5262 = vmatmul.mubr.msk.f32.vlgmr.msra.gmra.mrb[0].mxu1 %vm182_vm0, %v1130_v2  ;;  %5483 = vmatmul.mubr.msk.f32.gmra.mrb[14].mxu0 %vm182_vm0, %v6329_v12  ;;  %v7191_v2 = vld [vmem:[#allocation23_spill] sm:$0xff] }
  0xb2   : > { %5264 = vmatprep.mubr.msk.f32.mxu1 %vm182_vm0, %v6315_v9  ;;  %5485 = vmatprep.mubr.msk.f32.mxu0 %vm182_vm0, %v6333_v15  ;;  %v7192_v9 = vld [vmem:[#allocation26_spill] sm:$0xff] }
  0xb3   : > { %5310 = vmatpush3.msra.mxu1 %v6455_v62  ;;  %v6706_v62 = vld [vmem:[#allocation2 + $0x188] sm:$0xff] }
  0xb4   : > { %5609 = vmatprep.subr.mxu1 %v6047_v1 }
  0xb5   : > { %5265 = vmatmul.mubr.msk.f32.gmra.mrb[2].mxu1 %vm182_vm0, %v6331_v13  ;;  %5486 = vmatmul.mubr.msk.f32.gmra.mrb[16].mxu0 %vm182_vm0, %v6349_v18  ;;  %v7193_v13 = vld [vmem:[#allocation25_spill] sm:$0xff] }
  0xb6   : > { %5267 = vmatprep.mubr.msk.f32.mxu1 %vm182_vm0, %v6335_v16  ;;  %5488 = vmatprep.mubr.msk.f32.mxu0 %vm182_vm0, %v6355_v20 }
  0xb9   : > { %5268 = vmatmul.mubr.msk.f32.gmra.mrb[4].mxu1 %vm182_vm0, %v6351_v19  ;;  %5489 = vmatmul.mubr.msk.f32.gmra.mrb[18].mxu0 %vm182_vm0, %v6368_v22 }
  0xba   : > { %5270 = vmatprep.mubr.msk.f32.mxu1 %vm182_vm0, %v6357_v21  ;;  %5491 = vmatprep.mubr.msk.f32.mxu0 %vm182_vm0, %v6372_v24 }
  0xbd   : > { %5271 = vmatmul.mubr.msk.f32.gmra.mrb[6].mxu1 %vm182_vm0, %v6370_v23  ;;  %5492 = vmatmul.mubr.msk.f32.gmra.mrb[20].mxu0 %vm182_vm0, %v6384_v26 }
  0xbe   : > { %5273 = vmatprep.mubr.msk.f32.mxu1 %vm182_vm0, %v6374_v25  ;;  %5494 = vmatprep.mubr.msk.f32.mxu0 %vm182_vm0, %v6388_v28 }
  0xc1   : > { %5274 = vmatmul.mubr.msk.f32.gmra.mrb[8].mxu1 %vm182_vm0, %v6386_v27  ;;  %5495 = vmatmul.mubr.msk.f32.gmra.mrb[22].mxu0 %vm182_vm0, %v6400_v30 }
  0xc2   : > { %5276 = vmatprep.mubr.msk.f32.mxu1 %vm182_vm0, %v6390_v29  ;;  %5497 = vmatprep.mubr.msk.f32.mxu0 %vm182_vm0, %v6404_v53 }
  0xc5   : > { %5277 = vmatmul.mubr.msk.f32.gmra.mrb[10].mxu1 %vm182_vm0, %v6402_v50  ;;  %5498 = vmatmul.mubr.msk.f32.gmra.mrb[24].mxu0 %vm182_vm0, %v6416_v56  ;;  %v2960_v56 = vld [vmem:[#allocation2 + $0x198] sm:$0xff] }
  0xc6   : > { %5279 = vmatprep.mubr.msk.f32.mxu1 %vm182_vm0, %v6406_v55  ;;  %5500 = vmatprep.mubr.msk.f32.mxu0 %vm182_vm0, %v6420_v58  ;;  %v7194_v58 = vld [vmem:[#allocation27_spill] sm:$0xff] }
  0xc9   : > { %5280 = vmatmul.mubr.msk.f32.gmra.mrb[12].mxu1 %vm182_vm0, %v7191_v2  ;;  %5501 = vmatmul.mubr.msk.f32.gmra.mrb[26].mxu0 %vm182_vm0, %v7192_v9  ;;  %v2961_v9 = vld [vmem:[#allocation2 + $0x1a0] sm:$0xff] }
  0xca   : > { %5282 = vmatprep.mubr.msk.f32.mxu1 %vm182_vm0, %v7193_v13  ;;  %5503 = vmatprep.mubr.msk.f32.mxu0 %vm182_vm0, %v6696_v37 }
  0xcd   : > { %5283 = vmatmul.mubr.msk.f32.gmra.mrb[14].mxu1 %vm182_vm0, %v6434_v10  ;;  %5504 = vmatmul.mubr.msk.f32.gmra.mrb[28].mxu0 %vm182_vm0, %v6706_v62 }
  0xce   : > { %5285 = vmatprep.mubr.msk.f32.mxu1 %vm182_vm0, %v7194_v58  ;;  %5506 = vmatprep.mubr.msk.f32.mxu0 %vm182_vm0, %v2960_v56  ;;  %v7195_v56 = vld [vmem:[#allocation11_spill] sm:$0xff] }
  0xd1   : > { %5286 = vmatmul.mubr.msk.f32.gmra.mrb[16].mxu1 %vm182_vm0, %v6445_v59  ;;  %5507 = vmatmul.mubr.msk.f32.gmra.mrb[30].mxu0 %vm182_vm0, %v2961_v9  ;;  %v7196_v9 = vld [vmem:[#allocation28_spill] sm:$0xff] }
  0xd2   : > { %5288 = vmatprep.mubr.msk.f32.mxu1 %vm182_vm0, %v6447_v57  ;;  %5511 = vmatprep.mubr.msk.f32.mxu0 %vm182_vm0, %v6185_v36  ;;  %v7197_v36 = vld [vmem:[#allocation13_spill] sm:$0xff] }
  0xd5   : > { %5289 = vmatmul.mubr.msk.f32.gmra.mrb[18].mxu1 %vm182_vm0, %v6461_v11  ;;  %5512 = vmatmul.mubr.msk.f32.vlgmr.msra.gmra.mrb[0].mxu0 %vm182_vm0, %v6196_v38  ;;  %v7198_v38 = vld [vmem:[#allocation29_spill] sm:$0xff] }
  0xd6   : > { %5560 = vmatpush3.msra.mxu0 %v6566_v54  ;;  %5291 = vmatprep.mubr.msk.f32.mxu1 %vm182_vm0, %v6464_v33  ;;  %v7199_v54 = vld [vmem:[#allocation15_spill] sm:$0xff] }
  0xd7   : > { %5514 = vmatprep.mubr.msk.f32.mxu0 %vm182_vm0, %v7195_v56  ;;  %v7200_v56 = vld [vmem:[#allocation30_spill] sm:$0xff] }
  0xd9   : > { %5292 = vmatmul.mubr.msk.f32.gmra.mrb[20].mxu1 %vm182_vm0, %v7196_v9  ;;  %5515 = vmatmul.mubr.msk.f32.gmra.mrb[2].mxu0 %vm182_vm0, %v6215_v42  ;;  %v7201_v42 = vld [vmem:[#allocation17_spill] sm:$0xff] }
  0xda   : > { %5294 = vmatprep.mubr.msk.f32.mxu1 %vm182_vm0, %v6477_v32  ;;  %5517 = vmatprep.mubr.msk.f32.mxu0 %vm182_vm0, %v7197_v36  ;;  %v7202_v36 = vld [vmem:[#allocation31_spill] sm:$0xff] }
  0xdd   : > { %5295 = vmatmul.mubr.msk.f32.gmra.mrb[22].mxu1 %vm182_vm0, %v7198_v38  ;;  %5518 = vmatmul.mubr.msk.f32.gmra.mrb[4].mxu0 %vm182_vm0, %v6231_v46  ;;  %v7203_v46 = vld [vmem:[#allocation19_spill] sm:$0xff] }
  0xde   : > { %5297 = vmatprep.mubr.msk.f32.mxu1 %vm182_vm0, %v6489_v34  ;;  %5520 = vmatprep.mubr.msk.f32.mxu0 %vm182_vm0, %v7199_v54  ;;  %v7204_v54 = vld [vmem:[#allocation32_spill] sm:$0xff] }
  0xe1   : > { %5298 = vmatmul.mubr.msk.f32.gmra.mrb[24].mxu1 %vm182_vm0, %v7200_v56  ;;  %5521 = vmatmul.mubr.msk.f32.gmra.mrb[6].mxu0 %vm182_vm0, %v6248_v51  ;;  %v7205_v51 = vld [vmem:[#allocation21_spill] sm:$0xff] }
  0xe2   : > { %5300 = vmatprep.mubr.msk.f32.mxu1 %vm182_vm0, %v6501_v40  ;;  %5523 = vmatprep.mubr.msk.f32.mxu0 %vm182_vm0, %v7201_v42  ;;  %v7206_v42 = vld [vmem:[#allocation33_spill] sm:$0xff] }
  0xe5   : > { %5301 = vmatmul.mubr.msk.f32.gmra.mrb[26].mxu1 %vm182_vm0, %v7202_v36  ;;  %5524 = vmatmul.mubr.msk.f32.gmra.mrb[8].mxu0 %vm182_vm0, %v6275_v61  ;;  %v7207_v61 = vld [vmem:[#allocation7_spill] sm:$0xff] }
  0xe6   : > { %5303 = vmatprep.mubr.msk.f32.mxu1 %vm182_vm0, %v6513_v44  ;;  %5526 = vmatprep.mubr.msk.f32.mxu0 %vm182_vm0, %v7203_v46  ;;  %v7208_v46 = vld [vmem:[#allocation8_spill] sm:$0xff] }
  0xe9   : > { %5304 = vmatmul.mubr.msk.f32.gmra.mrb[28].mxu1 %vm182_vm0, %v7204_v54  ;;  %5527 = vmatmul.mubr.msk.f32.gmra.mrb[10].mxu0 %vm182_vm0, %v6295_v3  ;;  %v7209_v3 = vld [vmem:[#allocation9_spill] sm:$0xff] }
  0xea   : > { %5306 = vmatprep.mubr.msk.f32.mxu1 %vm182_vm0, %v6525_v48  ;;  %5529 = vmatprep.mubr.msk.f32.mxu0 %vm182_vm0, %v7205_v51  ;;  %v7211_v51 = vld [vmem:[#allocation36_spill] sm:$0xff] }
  0xed   : > { %5307 = vmatmul.mubr.msk.f32.gmra.mrb[30].mxu1 %vm182_vm0, %v7206_v42  ;;  %5530 = vmatmul.mubr.msk.f32.gmra.mrb[12].mxu0 %vm182_vm0, %v6311_v7  ;;  %v7210_v7 = vld [vmem:[#allocation10_spill] sm:$0xff] }
  0xee   : > { %5311 = vmatprep.mubr.msk.f32.mxu1 %vm182_vm0, %v7207_v61  ;;  %5532 = vmatprep.mubr.msk.f32.mxu0 %vm182_vm0, %v6549_v0  ;;  %v7212_v61 = vld [vmem:[#allocation12_spill] sm:$0xff] }
  0xf1   : > { %5312 = vmatmul.mubr.msk.f32.vlgmr.msra.gmra.mrb[0].mxu1 %vm182_vm0, %v7208_v46  ;;  %5533 = vmatmul.mubr.msk.f32.gmra.mrb[14].mxu0 %vm182_vm0, %v6559_v14  ;;  %v7214_v46 = vld [vmem:[#allocation14_spill] sm:$0xff] }
  0xf2   : > { %5314 = vmatprep.mubr.msk.f32.mxu1 %vm182_vm0, %v7209_v3  ;;  %5535 = vmatprep.mubr.msk.f32.mxu0 %vm182_vm0, %v6561_v5  ;;  %v7216_v3 = vld [vmem:[#allocation16_spill] sm:$0xff] }
  0xf3   : > { %5610 = vmatpush3.msra.mxu1 %v6047_v1  ;;  %v7213_v1 = vld [vmem:[#allocation37_spill] sm:$0xff] }
  0xf5   : > { %5315 = vmatmul.mubr.msk.f32.gmra.mrb[2].mxu1 %vm182_vm0, %v7210_v7  ;;  %5536 = vmatmul.mubr.msk.f32.gmra.mrb[16].mxu0 %vm182_vm0, %v6575_v31  ;;  %v7218_v7 = vld [vmem:[#allocation18_spill] sm:$0xff] }
  0xf6   : > { %5317 = vmatprep.mubr.msk.f32.mxu1 %vm182_vm0, %v6200_v39  ;;  %5538 = vmatprep.mubr.msk.f32.mxu0 %vm182_vm0, %v7211_v51  ;;  %v7215_v39 = vld [vmem:[#allocation38_spill] sm:$0xff] }
  0xf9   : > { %5318 = vmatmul.mubr.msk.f32.gmra.mrb[4].mxu1 %vm182_vm0, %v7212_v61  ;;  %5539 = vmatmul.mubr.msk.f32.gmra.mrb[18].mxu0 %vm182_vm0, %v6590_v17  ;;  %v7219_v61 = vld [vmem:[#allocation20_spill] sm:$0xff] }
  0xfa   : > { %5320 = vmatprep.mubr.msk.f32.mxu1 %vm182_vm0, %v6217_v43  ;;  %5541 = vmatprep.mubr.msk.f32.mxu0 %vm182_vm0, %v7213_v1  ;;  %v7217_v43 = vld [vmem:[#allocation39_spill] sm:$0xff] }
  0xfd   : > { %5321 = vmatmul.mubr.msk.f32.gmra.mrb[6].mxu1 %vm182_vm0, %v7214_v46  ;;  %5542 = vmatmul.mubr.msk.f32.gmra.mrb[20].mxu0 %vm182_vm0, %v6602_v41  ;;  %v3411_v46 = vld [vmem:[#allocation2 + $0x1a1] sm:$0xff] }
  0xfe   : > { %5323 = vmatprep.mubr.msk.f32.mxu1 %vm182_vm0, %v6233_v47  ;;  %5544 = vmatprep.mubr.msk.f32.mxu0 %vm182_vm0, %v7215_v39  ;;  %v6828_v47 = vld [vmem:[#allocation2 + $0x181] sm:$0xff] }
 0x101   : > { %5324 = vmatmul.mubr.msk.f32.gmra.mrb[8].mxu1 %vm182_vm0, %v7216_v3  ;;  %5545 = vmatmul.mubr.msk.f32.gmra.mrb[22].mxu0 %vm182_vm0, %v6614_v45 }
 0x102   : > { %5326 = vmatprep.mubr.msk.f32.mxu1 %vm182_vm0, %v6250_v52  ;;  %5547 = vmatprep.mubr.msk.f32.mxu0 %vm182_vm0, %v7217_v43  ;;  %v6838_v52 = vld [vmem:[#allocation2 + $0x189] sm:$0xff] }
 0x105   : > { %5327 = vmatmul.mubr.msk.f32.gmra.mrb[10].mxu1 %vm182_vm0, %v7218_v7  ;;  %5548 = vmatmul.mubr.msk.f32.gmra.mrb[24].mxu0 %vm182_vm0, %v6626_v49 }
 0x106   : > { %5329 = vmatprep.mubr.msk.f32.mxu1 %vm182_vm0, %v6280_v63  ;;  %5550 = vmatprep.mubr.msk.f32.mxu0 %vm182_vm0, %v6628_v35  ;;  %v3410_v63 = vld [vmem:[#allocation2 + $0x199] sm:$0xff] }
 0x109   : > { %5330 = vmatmul.mubr.msk.f32.gmra.mrb[12].mxu1 %vm182_vm0, %v7219_v61  ;;  %5551 = vmatmul.mubr.msk.f32.gmra.mrb[26].mxu0 %vm182_vm0, %v6638_v60 }
 0x10a   : > { %5332 = vmatprep.mubr.msk.f32.mxu1 %vm182_vm0, %v6297_v4  ;;  %5553 = vmatprep.mubr.msk.f32.mxu0 %vm182_vm0, %v6828_v47  ;;  %v7220_v4 = vld [vmem:[#allocation22_spill] sm:$0xff] }
 0x10d   : > { %5333 = vmatmul.mubr.msk.f32.gmra.mrb[14].mxu1 %vm182_vm0, %v6309_v6  ;;  %5554 = vmatmul.mubr.msk.f32.gmra.mrb[28].mxu0 %vm182_vm0, %v6838_v52  ;;  %v7221_v6 = vld [vmem:[#allocation24_spill] sm:$0xff] }
 0x10e   : > { %5335 = vmatprep.mubr.msk.f32.mxu1 %vm182_vm0, %v6313_v8  ;;  %5556 = vmatprep.mubr.msk.f32.mxu0 %vm182_vm0, %v3410_v63  ;;  %v7222_v8 = vld [vmem:[#allocation26_spill] sm:$0xff] }
 0x111   : > { %5336 = vmatmul.mubr.msk.f32.gmra.mrb[16].mxu1 %vm182_vm0, %v6329_v12  ;;  %5557 = vmatmul.mubr.msk.f32.gmra.mrb[30].mxu0 %vm182_vm0, %v3411_v46 }
 0x112   : > { %5338 = vmatprep.mubr.msk.f32.mxu1 %vm182_vm0, %v6333_v15  ;;  %5561 = vmatprep.mubr.msk.f32.mxu0 %vm182_vm0, %v6335_v16 }
 0x115   : > { %5339 = vmatmul.mubr.msk.f32.gmra.mrb[18].mxu1 %vm182_vm0, %v6349_v18  ;;  %5562 = vmatmul.mubr.msk.f32.vlgmr.msra.gmra.mrb[0].mxu0 %vm182_vm0, %v6351_v19 }
 0x116   : > { %5341 = vmatprep.mubr.msk.f32.mxu1 %vm182_vm0, %v6355_v20  ;;  %5564 = vmatprep.mubr.msk.f32.mxu0 %vm182_vm0, %v6357_v21 }
 0x119   : > { %5342 = vmatmul.mubr.msk.f32.gmra.mrb[20].mxu1 %vm182_vm0, %v6368_v22  ;;  %5565 = vmatmul.mubr.msk.f32.gmra.mrb[2].mxu0 %vm182_vm0, %v6370_v23 }
 0x11a   : > { %5344 = vmatprep.mubr.msk.f32.mxu1 %vm182_vm0, %v6372_v24  ;;  %5567 = vmatprep.mubr.msk.f32.mxu0 %vm182_vm0, %v6374_v25 }
 0x11d   : > { %5345 = vmatmul.mubr.msk.f32.gmra.mrb[22].mxu1 %vm182_vm0, %v6384_v26  ;;  %5568 = vmatmul.mubr.msk.f32.gmra.mrb[4].mxu0 %vm182_vm0, %v6386_v27 }
 0x11e   : > { %5347 = vmatprep.mubr.msk.f32.mxu1 %vm182_vm0, %v6388_v28  ;;  %5570 = vmatprep.mubr.msk.f32.mxu0 %vm182_vm0, %v6390_v29 }
 0x121   : > { %5348 = vmatmul.mubr.msk.f32.gmra.mrb[24].mxu1 %vm182_vm0, %v6400_v30  ;;  %5571 = vmatmul.mubr.msk.f32.gmra.mrb[6].mxu0 %vm182_vm0, %v6402_v50 }
 0x122   : > { %5350 = vmatprep.mubr.msk.f32.mxu1 %vm182_vm0, %v6404_v53  ;;  %5573 = vmatprep.mubr.msk.f32.mxu0 %vm182_vm0, %v6406_v55 }
 0x125   : > { %5351 = vmatmul.mubr.msk.f32.gmra.mrb[26].mxu1 %vm182_vm0, %v7220_v4  ;;  %5574 = vmatmul.mubr.msk.f32.gmra.mrb[8].mxu0 %vm182_vm0, %v7191_v2 }
 0x126   : > { %5353 = vmatprep.mubr.msk.f32.mxu1 %vm182_vm0, %v7221_v6  ;;  %5576 = vmatprep.mubr.msk.f32.mxu0 %vm182_vm0, %v7193_v13 }
 0x129   : > { %5354 = vmatmul.mubr.msk.f32.gmra.mrb[28].mxu1 %vm182_vm0, %v7222_v8  ;;  %5577 = vmatmul.mubr.msk.f32.gmra.mrb[10].mxu0 %vm182_vm0, %v6434_v10 }
 0x12a   : > { %5356 = vmatprep.mubr.msk.f32.mxu1 %vm182_vm0, %v6696_v37  ;;  %5579 = vmatprep.mubr.msk.f32.mxu0 %vm182_vm0, %v7194_v58 }
 0x12d   : > { %5357 = vmatmul.mubr.msk.f32.gmra.mrb[30].mxu1 %vm182_vm0, %v6706_v62  ;;  %5580 = vmatmul.mubr.msk.f32.gmra.mrb[12].mxu0 %vm182_vm0, %v6445_v59 }
 0x12e   : > { %5385 = vmatprep.mubr.msk.f32.mxu1 %vm182_vm0, %v6549_v0  ;;  %5582 = vmatprep.mubr.msk.f32.mxu0 %vm182_vm0, %v6447_v57 }
 0x131   : > { %5386 = vmatmul.mubr.msk.f32.vlgmr.msra.gmra.mrb[16].mxu1 %vm182_vm0, %v6559_v14  ;;  %5583 = vmatmul.mubr.msk.f32.gmra.mrb[14].mxu0 %vm182_vm0, %v6461_v11 }
 0x132   : > { %5388 = vmatprep.mubr.msk.f32.mxu1 %vm182_vm0, %v6561_v5  ;;  %5585 = vmatprep.mubr.msk.f32.mxu0 %vm182_vm0, %v6464_v33  ;;  %v7223_v33 = vld [vmem:[#allocation34_spill] sm:$0xff] }
 0x135   : > { %5389 = vmatmul.mubr.msk.f32.gmra.mrb[18].mxu1 %vm182_vm0, %v6575_v31  ;;  %5586 = vmatmul.mubr.msk.f32.gmra.mrb[16].mxu0 %vm182_vm0, %v7196_v9 }
 0x136   : > { %5391 = vmatprep.mubr.msk.f32.mxu1 %vm182_vm0, %v7211_v51  ;;  %5588 = vmatprep.mubr.msk.f32.mxu0 %vm182_vm0, %v6477_v32 }
 0x139   : > { %5392 = vmatmul.mubr.msk.f32.gmra.mrb[20].mxu1 %vm182_vm0, %v6590_v17  ;;  %5589 = vmatmul.mubr.msk.f32.gmra.mrb[18].mxu0 %vm182_vm0, %v7198_v38 }
 0x13a   : > { %5394 = vmatprep.mubr.msk.f32.mxu1 %vm182_vm0, %v7213_v1  ;;  %5591 = vmatprep.mubr.msk.f32.mxu0 %vm182_vm0, %v6489_v34 }
 0x13d   : > { %5395 = vmatmul.mubr.msk.f32.gmra.mrb[22].mxu1 %vm182_vm0, %v6602_v41  ;;  %5592 = vmatmul.mubr.msk.f32.gmra.mrb[20].mxu0 %vm182_vm0, %v7200_v56  ;;  %v3861_v41 = vld [vmem:[#allocation2 + $0x1a2] sm:$0xff] }
 0x13e   : > { %5397 = vmatprep.mubr.msk.f32.mxu1 %vm182_vm0, %v7215_v39  ;;  %5594 = vmatprep.mubr.msk.f32.mxu0 %vm182_vm0, %v6501_v40  ;;  %v3860_v40 = vld [vmem:[#allocation2 + $0x19a] sm:$0xff] }
 0x141   : > { %5398 = vmatmul.mubr.msk.f32.gmra.mrb[24].mxu1 %vm182_vm0, %v6614_v45  ;;  %5595 = vmatmul.mubr.msk.f32.gmra.mrb[22].mxu0 %vm182_vm0, %v7202_v36 }
 0x142   : > { %5400 = vmatprep.mubr.msk.f32.mxu1 %vm182_vm0, %v7217_v43  ;;  %5597 = vmatprep.mubr.msk.f32.mxu0 %vm182_vm0, %v6513_v44 }
 0x145   : > { %5401 = vmatmul.mubr.msk.f32.gmra.mrb[26].mxu1 %vm182_vm0, %v6626_v49  ;;  %5598 = vmatmul.mubr.msk.f32.gmra.mrb[24].mxu0 %vm182_vm0, %v7204_v54 }
 0x146   : > { %5403 = vmatprep.mubr.msk.f32.mxu1 %vm182_vm0, %v6628_v35  ;;  %5600 = vmatprep.mubr.msk.f32.mxu0 %vm182_vm0, %v6525_v48  ;;  %v7224_v35 = vld [vmem:[#allocation35_spill] sm:$0xff] }
 0x149   : > { %5404 = vmatmul.mubr.msk.f32.gmra.mrb[28].mxu1 %vm182_vm0, %v6638_v60  ;;  %5601 = vmatmul.mubr.msk.f32.gmra.mrb[26].mxu0 %vm182_vm0, %v7206_v42 }
 0x14a   : > { %5406 = vmatprep.mubr.msk.f32.mxu1 %vm182_vm0, %v6828_v47  ;;  %5603 = vmatprep.mubr.msk.f32.mxu0 %vm182_vm0, %v7223_v33 }
 0x14d   : > { %5407 = vmatmul.mubr.msk.f32.gmra.mrb[30].mxu1 %vm182_vm0, %v6838_v52  ;;  %5604 = vmatmul.mubr.msk.f32.gmra.mrb[28].mxu0 %vm182_vm0, %v7224_v35 }
 0x14e   : > { %5606 = vmatprep.mubr.msk.f32.mxu0 %vm182_vm0, %v3860_v40 }
 0x151   : > { %5607 = vmatmul.mubr.msk.f32.gmra.mrb[30].mxu0 %vm182_vm0, %v3861_v41 }
 0x1c4   : > { %v5313_v44 = vpop.f32.mrb[0].mxu1 }
 0x1c5   : > { %v1774_v45 = vpop.f32.mrb[1].mxu1 }
 0x1c8   : > { %v5316_v48 = vpop.f32.mrb[2].mxu1 }
 0x1c9   : > { %v1784_v49 = vpop.f32.mrb[3].mxu1 }
 0x1cc   : > { %v5319_v60 = vpop.f32.mrb[4].mxu1 }
 0x1cd   : > { %v1794_v0 = vpop.f32.mrb[5].mxu1 }
 0x1d0   : > { %v5322_v5 = vpop.f32.mrb[6].mxu1 }
 0x1d1   : > { %v1804_v12 = vpop.f32.mrb[7].mxu1 }
 0x1d4   : > { %v5325_v15 = vpop.f32.mrb[8].mxu1 }
 0x1d5   : > { %v1814_v16 = vpop.f32.mrb[9].mxu1 }
 0x1d8   : > { %v5328_v18 = vpop.f32.mrb[10].mxu1 }
 0x1d9   : > { %v6972_v19 = vpop.f32.mrb[11].mxu1 }
 0x1dc   : > { %v6974_v20 = vpop.f32.mrb[12].mxu1 }
 0x1dd   : > { %v6976_v21 = vpop.f32.mrb[13].mxu1 }
 0x1e0   : > { %v6978_v22 = vpop.f32.mrb[14].mxu1 }
 0x1e1   : > { %v6980_v23 = vpop.f32.mrb[15].mxu1 }
 0x1e8   : > { %v5563_v24 = vpop.f32.mrb[0].mxu0 }
 0x1e9   : > { %v5611_v25 = vadd.f32 %v5563_v24, %v5313_v44  ;;  %v4025_v26 = vpop.f32.mrb[1].mxu0 }
 0x1ea   : > { %v5612_v27 = vadd.f32 %v4025_v26, %v1774_v45 }
 0x1eb   : > { %v4350_v28 = vmul.f32 %v5611_v25, %v5611_v25  ;;  %4422 = vst.msk [vmem:[%s6987_s4 + $0x8] sm:$0xff] %vm182_vm0, %v5611_v25 }
 0x1ec   : > { %v4312_v29 = vadd.f32 %v5612_v27, %v5611_v25  ;;  %v4349_v30 = vmul.f32 %v5612_v27, %v5612_v27  ;;  %4421 = vst.msk [vmem:[%s6987_s4] sm:$0xff] %vm182_vm0, %v5612_v27  ;;  %v5566_v50 = vpop.f32.mrb[2].mxu0 }
 0x1ed   : > { %v5613_v53 = vadd.f32 %v5566_v50, %v5316_v48  ;;  %v4035_v55 = vpop.f32.mrb[3].mxu0 }
 0x1ee   : > { %v4381_v57 = vadd.f32 %v4350_v28, %v4349_v30  ;;  %v5614_v58 = vadd.f32 %v4035_v55, %v1784_v49 }
 0x1ef   : > { %4424 = vst.msk [vmem:[%s6987_s4 + $0x18] sm:$0xff] %vm182_vm0, %v5613_v53  ;;  %v4352_v14 = vmul.f32 %v5613_v53, %v5613_v53 }
 0x1f0   : > { %v4313_v59 = vadd.f32 %v5614_v58, %v4312_v29  ;;  %v4351_v10 = vmul.f32 %v5614_v58, %v5614_v58  ;;  %4423 = vst.msk [vmem:[%s6987_s4 + $0x10] sm:$0xff] %vm182_vm0, %v5614_v58  ;;  %v5569_v11 = vpop.f32.mrb[4].mxu0 }
 0x1f1   : > { %v5615_v31 = vadd.f32 %v5569_v11, %v5319_v60  ;;  %v4045_v32 = vpop.f32.mrb[5].mxu0 }
 0x1f2   : > { %v4382_v34 = vadd.f32 %v4381_v57, %v4351_v10  ;;  %v5616_v17 = vadd.f32 %v4045_v32, %v1794_v0  ;;  %v4314_v37 = vadd.f32 %v5613_v53, %v4313_v59 }
 0x1f3   : > { %4426 = vst.msk [vmem:[%s6987_s4 + $0x28] sm:$0xff] %vm182_vm0, %v5615_v31  ;;  %v4354_v36 = vmul.f32 %v5615_v31, %v5615_v31 }
 0x1f4   : > { %v4315_v2 = vadd.f32 %v5616_v17, %v4314_v37  ;;  %v4353_v13 = vmul.f32 %v5616_v17, %v5616_v17  ;;  %v4383_v62 = vadd.f32 %v4382_v34, %v4352_v14  ;;  %4425 = vst.msk [vmem:[%s6987_s4 + $0x20] sm:$0xff] %vm182_vm0, %v5616_v17  ;;  %v5572_v9 = vpop.f32.mrb[6].mxu0 }
 0x1f5   : > { %v5617_v38 = vadd.f32 %v5572_v9, %v5322_v5  ;;  %v4055_v56 = vpop.f32.mrb[7].mxu0 }
 0x1f6   : > { %v4384_v54 = vadd.f32 %v4383_v62, %v4353_v13  ;;  %v5618_v42 = vadd.f32 %v4055_v56, %v1804_v12  ;;  %v4316_v51 = vadd.f32 %v5615_v31, %v4315_v2 }
 0x1f7   : > { %4428 = vst.msk [vmem:[%s6987_s4 + $0x38] sm:$0xff] %vm182_vm0, %v5617_v38  ;;  %v4356_v61 = vmul.f32 %v5617_v38, %v5617_v38 }
 0x1f8   : > { %v4317_v1 = vadd.f32 %v5618_v42, %v4316_v51  ;;  %v4355_v39 = vmul.f32 %v5618_v42, %v5618_v42  ;;  %v4385_v3 = vadd.f32 %v4384_v54, %v4354_v36  ;;  %4427 = vst.msk [vmem:[%s6987_s4 + $0x30] sm:$0xff] %vm182_vm0, %v5618_v42  ;;  %v5575_v43 = vpop.f32.mrb[8].mxu0 }
 0x1f9   : > { %v5619_v7 = vadd.f32 %v5575_v43, %v5325_v15  ;;  %v4065_v47 = vpop.f32.mrb[9].mxu0 }
 0x1fa   : > { %v4386_v52 = vadd.f32 %v4385_v3, %v4355_v39  ;;  %v5620_v63 = vadd.f32 %v4065_v47, %v1814_v16  ;;  %v4318_v46 = vadd.f32 %v5617_v38, %v4317_v1 }
 0x1fb   : > { %4430 = vst.msk [vmem:[%s6987_s4 + $0x48] sm:$0xff] %vm182_vm0, %v5619_v7  ;;  %v4358_v41 = vmul.f32 %v5619_v7, %v5619_v7 }
 0x1fc   : > { %v4319_v4 = vadd.f32 %v5620_v63, %v4318_v46  ;;  %v4357_v6 = vmul.f32 %v5620_v63, %v5620_v63  ;;  %v4387_v8 = vadd.f32 %v4386_v52, %v4356_v61  ;;  %4429 = vst.msk [vmem:[%s6987_s4 + $0x40] sm:$0xff] %vm182_vm0, %v5620_v63  ;;  %v5578_v33 = vpop.f32.mrb[10].mxu0 }
 0x1fd   : > { %v5621_v40 = vadd.f32 %v5578_v33, %v5328_v18  ;;  %v4075_v35 = vpop.f32.mrb[11].mxu0 }
 0x1fe   : > { %v4388_v44 = vadd.f32 %v4387_v8, %v4357_v6  ;;  %v5622_v45 = vadd.f32 %v4075_v35, %v6972_v19  ;;  %v4320_v48 = vadd.f32 %v5619_v7, %v4319_v4 }
 0x1ff   : > { %4432 = vst.msk [vmem:[%s6987_s4 + $0x58] sm:$0xff] %vm182_vm0, %v5621_v40  ;;  %v4360_v16 = vmul.f32 %v5621_v40, %v5621_v40 }
 0x200   : > { %v4321_v49 = vadd.f32 %v5622_v45, %v4320_v48  ;;  %v4359_v60 = vmul.f32 %v5622_v45, %v5622_v45  ;;  %v4389_v0 = vadd.f32 %v4388_v44, %v4358_v41  ;;  %4431 = vst.msk [vmem:[%s6987_s4 + $0x50] sm:$0xff] %vm182_vm0, %v5622_v45  ;;  %v5581_v5 = vpop.f32.mrb[12].mxu0 }
 0x201   : > { %v5623_v12 = vadd.f32 %v5581_v5, %v6974_v20  ;;  %v4085_v15 = vpop.f32.mrb[13].mxu0 }
 0x202   : > { %v4390_v18 = vadd.f32 %v4389_v0, %v4359_v60  ;;  %v5624_v24 = vadd.f32 %v4085_v15, %v6976_v21  ;;  %v4322_v25 = vadd.f32 %v5621_v40, %v4321_v49 }
 0x203   : > { %4434 = vst.msk [vmem:[%s6987_s4 + $0x68] sm:$0xff] %vm182_vm0, %v5623_v12  ;;  %v4362_v53 = vmul.f32 %v5623_v12, %v5623_v12 }
 0x204   : > { %v4323_v19 = vadd.f32 %v5624_v24, %v4322_v25  ;;  %v4361_v26 = vmul.f32 %v5624_v24, %v5624_v24  ;;  %v4391_v27 = vadd.f32 %v4390_v18, %v4360_v16  ;;  %4433 = vst.msk [vmem:[%s6987_s4 + $0x60] sm:$0xff] %vm182_vm0, %v5624_v24  ;;  %v5387_v28 = vpop.f32.mrb[16].mxu1  ;;  %v5584_v29 = vpop.f32.mrb[14].mxu0 }
 0x205   : > { %v5625_v30 = vadd.f32 %v5584_v29, %v6978_v22  ;;  %v2304_v20 = vpop.f32.mrb[17].mxu1  ;;  %v4095_v50 = vpop.f32.mrb[15].mxu0 }
 0x206   : > { %v4392_v55 = vadd.f32 %v4391_v27, %v4361_v26  ;;  %v5626_v21 = vadd.f32 %v4095_v50, %v6980_v23  ;;  %v4324_v57 = vadd.f32 %v5623_v12, %v4323_v19 }
 0x207   : > { %4436 = vst.msk [vmem:[%s6987_s4 + $0x78] sm:$0xff] %vm182_vm0, %v5625_v30  ;;  %v4364_v34 = vmul.f32 %v5625_v30, %v5625_v30 }
 0x208   : > { %v4325_v58 = vadd.f32 %v5626_v21, %v4324_v57  ;;  %v4363_v59 = vmul.f32 %v5626_v21, %v5626_v21  ;;  %v4393_v10 = vadd.f32 %v4392_v55, %v4362_v53  ;;  %4435 = vst.msk [vmem:[%s6987_s4 + $0x70] sm:$0xff] %vm182_vm0, %v5626_v21  ;;  %v5390_v11 = vpop.f32.mrb[18].mxu1  ;;  %v5587_v31 = vpop.f32.mrb[16].mxu0 }
 0x209   : > { %v5627_v32 = vadd.f32 %v5587_v31, %v5387_v28  ;;  %v2314_v22 = vpop.f32.mrb[19].mxu1  ;;  %v4105_v14 = vpop.f32.mrb[17].mxu0 }
 0x20a   : > { %v4394_v17 = vadd.f32 %v4393_v10, %v4363_v59  ;;  %v5628_v37 = vadd.f32 %v4105_v14, %v2304_v20  ;;  %v4326_v23 = vadd.f32 %v5625_v30, %v4325_v58 }
 0x20b   : > { %4438 = vst.msk [vmem:[%s6987_s4 + $0x88] sm:$0xff] %vm182_vm0, %v5627_v32  ;;  %v4366_v42 = vmul.f32 %v5627_v32, %v5627_v32 }
 0x20c   : > { %v4327_v2 = vadd.f32 %v5628_v37, %v4326_v23  ;;  %v4365_v13 = vmul.f32 %v5628_v37, %v5628_v37  ;;  %v4395_v62 = vadd.f32 %v4394_v17, %v4364_v34  ;;  %4437 = vst.msk [vmem:[%s6987_s4 + $0x80] sm:$0xff] %vm182_vm0, %v5628_v37  ;;  %v5393_v9 = vpop.f32.mrb[20].mxu1  ;;  %v5590_v38 = vpop.f32.mrb[18].mxu0 }
 0x20d   : > { %v5629_v56 = vadd.f32 %v5590_v38, %v5390_v11  ;;  %v2324_v36 = vpop.f32.mrb[21].mxu1  ;;  %v4115_v54 = vpop.f32.mrb[19].mxu0 }
 0x20e   : > { %v4396_v51 = vadd.f32 %v4395_v62, %v4365_v13  ;;  %v5630_v1 = vadd.f32 %v4115_v54, %v2314_v22  ;;  %v4328_v39 = vadd.f32 %v5627_v32, %v4327_v2 }
 0x20f   : > { %4440 = vst.msk [vmem:[%s6987_s4 + $0x98] sm:$0xff] %vm182_vm0, %v5629_v56  ;;  %v4368_v4 = vmul.f32 %v5629_v56, %v5629_v56 }
 0x210   : > { %v4329_v3 = vadd.f32 %v5630_v1, %v4328_v39  ;;  %v4367_v43 = vmul.f32 %v5630_v1, %v5630_v1  ;;  %v4397_v7 = vadd.f32 %v4396_v51, %v4366_v42  ;;  %4439 = vst.msk [vmem:[%s6987_s4 + $0x90] sm:$0xff] %vm182_vm0, %v5630_v1  ;;  %v5396_v47 = vpop.f32.mrb[22].mxu1  ;;  %v5593_v61 = vpop.f32.mrb[20].mxu0 }
 0x211   : > { %v5631_v52 = vadd.f32 %v5593_v61, %v5393_v9  ;;  %v2334_v63 = vpop.f32.mrb[23].mxu1  ;;  %v4125_v46 = vpop.f32.mrb[21].mxu0 }
 0x212   : > { %v4398_v6 = vadd.f32 %v4397_v7, %v4367_v43  ;;  %v5632_v8 = vadd.f32 %v4125_v46, %v2324_v36  ;;  %v4330_v33 = vadd.f32 %v5629_v56, %v4329_v3 }
 0x213   : > { %4442 = vst.msk [vmem:[%s6987_s4 + $0xa8] sm:$0xff] %vm182_vm0, %v5631_v52  ;;  %v4370_v0 = vmul.f32 %v5631_v52, %v5631_v52 }
 0x214   : > { %v4331_v40 = vadd.f32 %v5632_v8, %v4330_v33  ;;  %v4369_v35 = vmul.f32 %v5632_v8, %v5632_v8  ;;  %v4399_v41 = vadd.f32 %v4398_v6, %v4368_v4  ;;  %4441 = vst.msk [vmem:[%s6987_s4 + $0xa0] sm:$0xff] %vm182_vm0, %v5632_v8  ;;  %v5399_v44 = vpop.f32.mrb[24].mxu1  ;;  %v5596_v45 = vpop.f32.mrb[22].mxu0 }
 0x215   : > { %v5633_v48 = vadd.f32 %v5596_v45, %v5396_v47  ;;  %v2344_v49 = vpop.f32.mrb[25].mxu1  ;;  %v4135_v60 = vpop.f32.mrb[23].mxu0 }
 0x216   : > { %v4400_v5 = vadd.f32 %v4399_v41, %v4369_v35  ;;  %v5634_v12 = vadd.f32 %v4135_v60, %v2334_v63  ;;  %v4332_v15 = vadd.f32 %v5631_v52, %v4331_v40 }
 0x217   : > { %4444 = vst.msk [vmem:[%s6987_s4 + $0xb8] sm:$0xff] %vm182_vm0, %v5633_v48  ;;  %v4372_v29 = vmul.f32 %v5633_v48, %v5633_v48 }
 0x218   : > { %v4333_v16 = vadd.f32 %v5634_v12, %v4332_v15  ;;  %v4371_v18 = vmul.f32 %v5634_v12, %v5634_v12  ;;  %v4401_v24 = vadd.f32 %v4400_v5, %v4370_v0  ;;  %4443 = vst.msk [vmem:[%s6987_s4 + $0xb0] sm:$0xff] %vm182_vm0, %v5634_v12  ;;  %v5402_v25 = vpop.f32.mrb[26].mxu1  ;;  %v5599_v19 = vpop.f32.mrb[24].mxu0 }
 0x219   : > { %v5635_v26 = vadd.f32 %v5599_v19, %v5399_v44  ;;  %v2354_v27 = vpop.f32.mrb[27].mxu1  ;;  %v4145_v28 = vpop.f32.mrb[25].mxu0 }
 0x21a   : > { %v4402_v30 = vadd.f32 %v4401_v24, %v4371_v18  ;;  %v5636_v20 = vadd.f32 %v4145_v28, %v2344_v49  ;;  %v4334_v50 = vadd.f32 %v5633_v48, %v4333_v16 }
 0x21b   : > { %4446 = vst.msk [vmem:[%s6987_s4 + $0xc8] sm:$0xff] %vm182_vm0, %v5635_v26  ;;  %v4374_v31 = vmul.f32 %v5635_v26, %v5635_v26 }
 0x21c   : > { %v4335_v53 = vadd.f32 %v5636_v20, %v4334_v50  ;;  %v4373_v55 = vmul.f32 %v5636_v20, %v5636_v20  ;;  %v4403_v21 = vadd.f32 %v4402_v30, %v4372_v29  ;;  %4445 = vst.msk [vmem:[%s6987_s4 + $0xc0] sm:$0xff] %vm182_vm0, %v5636_v20  ;;  %v5405_v57 = vpop.f32.mrb[28].mxu1  ;;  %v5602_v58 = vpop.f32.mrb[26].mxu0 }
 0x21d   : > { %v5637_v59 = vadd.f32 %v5602_v58, %v5402_v25  ;;  %v2364_v10 = vpop.f32.mrb[29].mxu1  ;;  %v4155_v11 = vpop.f32.mrb[27].mxu0 }
 0x21e   : > { %v4404_v32 = vadd.f32 %v4403_v21, %v4373_v55  ;;  %v5638_v22 = vadd.f32 %v4155_v11, %v2354_v27  ;;  %v4336_v14 = vadd.f32 %v5635_v26, %v4335_v53 }
 0x21f   : > { %4448 = vst.msk [vmem:[%s6987_s4 + $0xd8] sm:$0xff] %vm182_vm0, %v5637_v59  ;;  %v4376_v38 = vmul.f32 %v5637_v59, %v5637_v59 }
 0x220   : > { %v4337_v34 = vadd.f32 %v5638_v22, %v4336_v14  ;;  %v4375_v17 = vmul.f32 %v5638_v22, %v5638_v22  ;;  %v4405_v37 = vadd.f32 %v4404_v32, %v4374_v31  ;;  %4447 = vst.msk [vmem:[%s6987_s4 + $0xd0] sm:$0xff] %vm182_vm0, %v5638_v22  ;;  %v5408_v23 = vpop.f32.mrb[30].mxu1  ;;  %v5605_v2 = vpop.f32.mrb[28].mxu0 }
 0x221   : > { %v5639_v13 = vadd.f32 %v5605_v2, %v5405_v57  ;;  %v2374_v62 = vpop.f32.mrb[31].mxu1  ;;  %v4165_v9 = vpop.f32.mrb[29].mxu0 }
 0x222   : > { %v4406_v56 = vadd.f32 %v4405_v37, %v4375_v17  ;;  %v5640_v36 = vadd.f32 %v4165_v9, %v2364_v10  ;;  %v4338_v54 = vadd.f32 %v5637_v59, %v4337_v34 }
 0x223   : > { %4450 = vst.msk [vmem:[%s6987_s4 + $0xe8] sm:$0xff] %vm182_vm0, %v5639_v13  ;;  %v4378_v7 = vmul.f32 %v5639_v13, %v5639_v13 }
 0x224   : > { %v4339_v42 = vadd.f32 %v5640_v36, %v4338_v54  ;;  %v4377_v51 = vmul.f32 %v5640_v36, %v5640_v36  ;;  %v4407_v1 = vadd.f32 %v4406_v56, %v4376_v38  ;;  %4449 = vst.msk [vmem:[%s6987_s4 + $0xe0] sm:$0xff] %vm182_vm0, %v5640_v36  ;;  %v5608_v39 = vpop.f32.mrb[30].mxu0 }
 0x225   : > { %v5641_v3 = vadd.f32 %v5608_v39, %v5408_v23  ;;  %v4175_v43 = vpop.f32.mrb[31].mxu0 }
 0x226   : > { %v4408_v47 = vadd.f32 %v4407_v1, %v4377_v51  ;;  %v5642_v61 = vadd.f32 %v4175_v43, %v2374_v62  ;;  %v4340_v52 = vadd.f32 %v5639_v13, %v4339_v42 }
 0x227   : > { %4452 = vst.msk [vmem:[%s6987_s4 + $0xf8] sm:$0xff] %vm182_vm0, %v5641_v3  ;;  %v4380_v6 = vmul.f32 %v5641_v3, %v5641_v3 }
 0x228   : > { %v4341_v63 = vadd.f32 %v5642_v61, %v4340_v52  ;;  %v4379_v46 = vmul.f32 %v5642_v61, %v5642_v61  ;;  %v4409_v4 = vadd.f32 %v4408_v47, %v4378_v7  ;;  %4451 = vst.msk [vmem:[%s6987_s4 + $0xf0] sm:$0xff] %vm182_vm0, %v5642_v61 }
 0x22a   : > { %v4342_v8 = vadd.f32 %v5641_v3, %v4341_v63  ;;  %v4410_v33 = vadd.f32 %v4409_v4, %v4379_v46 }
 0x22c   : > { %v4343_v40 = vrot.slane %v4342_v8, 4  ;;  %v4411_v35 = vadd.f32 %v4410_v33, %v4380_v6 }
 0x22e   : > { %v4344_v41 = vadd.f32 %v4343_v40, %v4342_v8  ;;  %v4412_v44 = vrot.slane %v4411_v35, 4 }
 0x230   : > { %v4345_v45 = vrot.slane %v4344_v41, 2  ;;  %v4413_v48 = vadd.f32 %v4412_v44, %v4411_v35 }
 0x232   : > { %v4346_v49 = vadd.f32 %v4345_v45, %v4344_v41  ;;  %v4414_v60 = vrot.slane %v4413_v48, 2 }
 0x234   : > { %v4347_v0 = vrot.slane %v4346_v49, 1  ;;  %v4415_v5 = vadd.f32 %v4414_v60, %v4413_v48 }
 0x236   : > { %v4416_v12 = vrot.slane %v4415_v5, 1  ;;  %v4348_v15 = vadd.f32 %v4347_v0, %v4346_v49 }
 0x238   : > { %v4417_v16 = vadd.f32 %v4416_v12, %v4415_v5 }
 0x23a   : > { %v4419_v18 = vsel %vm4418_vm3, %v4348_v15, %v4417_v16 }
 0x23b   : > { %4420 = vst [vmem:[%s171_s8] sm:$0x3] %v4419_v18 }
 0x23c   : > { %5920 = shalt.err (!%p5917_p3)
}
 0x23d   : > { %s5921_s26 = scalar_lea.hbm %s7063_s17, 32  ;;  %s5925_s29 = scalar_lea.hbm %s7108_s3, 64 }
 0x23e   : > { %p5922_p4 = scmp.ne.s32.totalorder %s7063_s17, %s5921_s26  ;;  %p5926_p9 = scmp.lt.u32.totalorder %s7063_s17, %s7108_s3 }
 0x23f   : > { %p5927_p10 = scmp.lt.u32.totalorder %s5925_s29, %s5921_s26  ;;  %p5929_p12 = scmp.lt.u32.totalorder %s5921_s26, %s7063_s17 }
 0x240   : > { %p5923_p7 = pnand %p5922_p4, %p6031_p5 }
 0x241   : > { %p5928_p11 = por %p5927_p10, %p5926_p9 }
 0x242   : > { %p5924_p8 = pneg %p5923_p7 }
 0x243   : > { %p5930_p13 = por %p5929_p12, %p5928_p11 }
 0x245   : > { %p5931_p0 = pnand %p5930_p13, %p5924_p8 }
 0x247   : > { %5934 = shalt.err (!%p5931_p0)
}
 0x248   : > { %5867 = dma.vmem_to_hbm [thread:$0]  (%p6031_p5), %s7065_s9, 32, %s7063_s17, %s4459_s19  }
 0x249 PF: > { %p5873_p1 = scmp.ge.s32.totalorder %s5969_s15, 2  ;;  %s4495_s5 = sand.u32 1, %s5957_s12  }
 0x24a   : > { %s4496_s6 = scalar_lea.sflag [#allocation5], %s4495_s5 }
 0x24b   : > { %p5870_p2 = pnand %p5873_p1, %p6035_p6 }
 0x24d   : > { %5952 = dma.done.wait (!%p5870_p2), %s4496_s6, 32  }
 0x24e   : > { %5954 = vsyncadd (!%p5870_p2), %s4496_s6, 4294967264  ;;  %p14_p3 = scmp.ge.s32.totalorder %s6018_s18, 4   ;;  %s7225_s12 = smov %s5961_s13 }
 0x24f   : > { %s7226_s13 = smov %s5965_s14  ;;  %s7227_s14 = smov %s6029_s21 }
 0x250   : > { %s7228_s15 = smov %s6018_s18  ;;  %16 = sbr.rel (!%p14_p3) target bundleno = 3 (0x3), region = 78 }
 0x257   :  { %4501 = vsyncpa [#allocation5], 1 }
 0x258   :  { %4503 = vsyncpa [#allocation5 + $0x1], 1 }

</bundles_post_ra>
